<compile_context>
chip_gen: v6e
topology: v6e:2x2x1
jax: 0.10.0
libtpu: 0.0.40
codegen_flags: <defaults>
</compile_context>

<pallas_src>
import jax
import jax.numpy as jnp
from jax.experimental import pallas as pl
from jax.experimental.pallas import tpu as pltpu


# ----------------------------------------------------------- hardware query ----
def _query_tpu():
    """Best-effort generation info (VMEM capacity, #TensorCores); safe defaults."""
    vmem_cap = 128 * 1024 * 1024
    n_tc = 1
    try:
        info = pltpu.get_tpu_info()
        vmem_cap = int(getattr(info, "vmem_capacity_bytes", vmem_cap))
        for name in ("num_tensorcores", "tensorcore_count", "num_cores"):
            val = getattr(info, name, None)
            if val:
                n_tc = int(val)
                break
    except Exception:
        pass
    if n_tc == 1:
        try:  # v7x exposes 2 TensorCores per chip
            if "7" in jax.devices()[0].device_kind:
                n_tc = 2
        except Exception:
            pass
    return vmem_cap, n_tc


_VMEM_CAP, _NUM_TC = _query_tpu()
# explicit scoped-VMEM limit; keep <= ~40 MiB so v7x (64 MiB/TC) retains headroom
_VMEM_LIMIT = max(16 * 1024 * 1024, min(40 * 1024 * 1024, _VMEM_CAP // 2))


def _round_up(x, m):
    return ((x + m - 1) // m) * m


def _choose_tm(m, k, n, a_bytes, o_bytes):
    """M-tile: VMEM-byte-budgeted; biggest single tile on 1-TC parts (v5e/v6e),
    >= 4 grid steps (>= 2 per TensorCore) on 2-TC parts (v7x)."""
    if m <= 16:
        return m                                    # full extent, single grid step
    m16 = _round_up(m, 16)
    budget = (_VMEM_LIMIT * 3) // 5                 # headroom for weights / semaphores
    fixed = 2 * k * n * 2                           # double-buffered bf16 weight tile
    min_steps = 4 if _NUM_TC >= 2 else 1
    cands = sorted({t for t in (4096, 2048, 1024, 512, 256, 128, 64, 32, 16, m16)
                    if t <= m16}, reverse=True)
    feasible = [t for t in cands
                if fixed + 2 * t * (k * a_bytes + n * o_bytes) + t * n * 4 <= budget]
    if not feasible:
        return 16
    for t in feasible:
        if -(-m // t) >= min_steps:
            return t
    return feasible[-1]


# --------------------------------------------------------------- MXU kernels ----
def _mm_kernel(a_ref, b_ref, o_ref):
    o_ref[...] = jnp.dot(a_ref[...], b_ref[...],
                         preferred_element_type=jnp.float32).astype(o_ref.dtype)


def _mm_tanh_kernel(a_ref, b_ref, o_ref):
    # layer 4: tanh fused as an EUP epilogue on the f32 accumulator
    o_ref[...] = jnp.tanh(jnp.dot(a_ref[...], b_ref[...],
                                  preferred_element_type=jnp.float32)).astype(o_ref.dtype)


def _mm_stats_kernel(a_ref, b_ref, o_ref, sum_ref, sq_ref):
    # layer 1: per-lane sum / sum-of-squares fused as an epilogue (f32, pre-downcast)
    @pl.when(pl.program_id(0) == 0)
    def _():
        sum_ref[...] = jnp.zeros_like(sum_ref)
        sq_ref[...] = jnp.zeros_like(sq_ref)

    acc = jnp.dot(a_ref[...].astype(jnp.bfloat16), b_ref[...],
                  preferred_element_type=jnp.float32)
    sum_ref[...] += jnp.sum(acc, axis=0, keepdims=True)
    sq_ref[...] += jnp.sum(acc * acc, axis=0, keepdims=True)
    o_ref[...] = acc.astype(o_ref.dtype)


def _mm_call(a, b, kernel, extra_out_shapes=(), extra_out_specs=(), semantics="parallel"):
    m, k = a.shape
    kb, n = b.shape
    assert k == kb
    tm = _choose_tm(m, k, n, a.dtype.itemsize, 2)
    m_pad = _round_up(m, tm)
    if m_pad != m:
        a = jnp.pad(a, ((0, m_pad - m), (0, 0)))    # zero rows: inert for stats, sliced off
    outs = pl.pallas_call(
        kernel,
        out_shape=(jax.ShapeDtypeStruct((m_pad, n), jnp.bfloat16),) + tuple(extra_out_shapes),
        grid_spec=pltpu.PrefetchScalarGridSpec(
            num_scalar_prefetch=0,
            grid=(m_pad // tm,),
            in_specs=[pl.BlockSpec((tm, k), lambda i: (i, 0)),
                      # TODO(synk): pipeline_mode=pl.Buffered(1) on this constant-index
                      # weight block would save its second VMEM buffer.
                      pl.BlockSpec((k, n), lambda i: (0, 0))],
            out_specs=(pl.BlockSpec((tm, n), lambda i: (i, 0)),) + tuple(extra_out_specs)),
        compiler_params=pltpu.CompilerParams(dimension_semantics=(semantics,),
                                             vmem_limit_bytes=_VMEM_LIMIT),
    )(a, b)
    outs = outs if isinstance(outs, (tuple, list)) else (outs,)
    out = outs[0][:m] if m_pad != m else outs[0]
    return (out,) + tuple(outs[1:])


def pallas_matmul(a, b, *, fuse_tanh=False):
    """out = (tanh?)(a @ b) stored bf16;  a: (M, K) bf16/f32, b: (K, N) bf16."""
    return _mm_call(a, b, _mm_tanh_kernel if fuse_tanh else _mm_kernel)[0]


def pallas_matmul_stats(a, b):
    """out = a @ b (bf16) plus fused f32 per-column sum / sum-of-squares epilogue."""
    n = b.shape[1]
    extra_shapes = (jax.ShapeDtypeStruct((1, n), jnp.float32),
                    jax.ShapeDtypeStruct((1, n), jnp.float32))
    extra_specs = (pl.BlockSpec((1, n), lambda i: (0, 0)),
                   pl.BlockSpec((1, n), lambda i: (0, 0)))
    out, s, q = _mm_call(a, b, _mm_stats_kernel, extra_shapes, extra_specs,
                         semantics="arbitrary")
    return out, s[0], q[0]


# ------------------------------------------------- weight layout transforms ----
# ConvTranspose2d(k=4, s=2, p=1) parity decomposition: a 2x2 window of the zero-padded
# input at position (u, v) produces the output 2x2 block at rows {2u-1, 2u} and cols
# {2v-1, 2v}; the kernel tap for window offset a and output row parity rp is
# _TAP[rp][a] (same for columns).
_TAP = ((2, 0), (3, 1))


def _weight_to_cols_l1(w_pt):
    """(nz, C, 4, 4) -> (nz, 16*C) bf16: layer 1 on a 1x1 input is a pure matmul."""
    cin, cout, k, _ = w_pt.shape
    return jnp.transpose(w_pt, (0, 2, 3, 1)).reshape(cin, k * k * cout).astype(jnp.bfloat16)


def _weight_to_parity_cols(w_pt, cout_pad):
    """(Cin, Cout, 4, 4) -> (4*Cin, 4*cout_pad) bf16 parity-decomposed weight matrix.

    K rows ordered (a, b, ci); output lanes ordered (rp, cp, co) with co zero-padded
    to cout_pad so that 4*cout_pad is a multiple of 128 (lane-dense stores).
    """
    cin, cout, _, _ = w_pt.shape
    k_blocks = []
    for a in (0, 1):
        for b in (0, 1):
            lane_blocks = []
            for rp in (0, 1):
                for cp in (0, 1):
                    sub = w_pt[:, :, _TAP[rp][a], _TAP[cp][b]]        # (cin, cout)
                    if cout_pad != cout:
                        sub = jnp.pad(sub, ((0, 0), (0, cout_pad - cout)))
                    lane_blocks.append(sub)
            k_blocks.append(jnp.concatenate(lane_blocks, axis=1))     # (cin, 4*cout_pad)
    return jnp.concatenate(k_blocks, axis=0).astype(jnp.bfloat16)     # (4cin, 4*cout_pad)


# ------------------------------------------------------------------ XLA glue ----
def _act_im2col(y_raw, scale, shift):
    """relu(y*scale + shift), zero-pad by 1, gather 2x2 windows -> (M, 4*C) bf16.

    BN affine + ReLU must be applied *before* the zero pad, so it is fused here (one
    fused XLA pass over y) rather than inside the next matmul kernel.
    """
    nb, h, w, c = y_raw.shape
    y = jnp.maximum(y_raw.astype(jnp.float32) * scale + shift, 0.0).astype(jnp.bfloat16)
    yp = jnp.pad(y, ((0, 0), (1, 1), (1, 1), (0, 0)))
    parts = [yp[:, a:a + h + 1, b:b + w + 1, :] for a in (0, 1) for b in (0, 1)]
    cols = jnp.concatenate(parts, axis=-1)                       # (nb, h+1, w+1, 4*C)
    return cols.reshape(nb * (h + 1) * (w + 1), 4 * c)


def _parity_to_image(o, nb, h, w, cout):
    """(nb*(h+1)*(w+1), 4*cout_pad) parity-stacked matmul out -> (nb, 2h, 2w, cout)."""
    cout_pad = o.shape[-1] // 4
    o6 = o.reshape(nb, h + 1, w + 1, 2, 2, cout_pad)[..., :cout]   # (n,u,v,rp,cp,co)
    o6 = jnp.transpose(o6, (0, 1, 3, 2, 4, 5))                     # (n,u,rp,v,cp,co)
    full = o6.reshape(nb, 2 * (h + 1), 2 * (w + 1), cout)          # virtual row = 2u+rp
    return full[:, 1:2 * h + 1, 1:2 * w + 1, :]                    # crop the dropped border


def _bn_scale_shift(ssum, ssq, count, gamma, beta, eps=1e-5):
    mean = ssum / count
    var = jnp.maximum(ssq / count - mean * mean, 0.0)   # clamp E[x^2]-m^2 cancellation
    scale = gamma * jax.lax.rsqrt(var + eps)
    return scale, beta - mean * scale


# ------------------------------------------------------------ full Generator ----
def generator_forward(x_nchw, params):
    nb = x_nchw.shape[0]
    x2d = x_nchw.reshape(nb, -1).astype(jnp.float32)            # latent is 1x1 spatial

    w1, w2, w3, w4 = params["w1"], params["w2"], params["w3"], params["w4"]
    c1, c2, c3, c4 = w1.shape[1], w2.shape[1], w3.shape[1], w4.shape[1]
    c2p, c3p, c4p = (_round_up(c, 32) for c in (c2, c3, c4))    # 4*cp multiple of 128

    wb1 = _weight_to_cols_l1(w1)                                # (nz, 16*c1)
    wb2 = _weight_to_parity_cols(w2, c2p)                       # (4*c1, 4*c2p)
    wb3 = _weight_to_parity_cols(w3, c3p)                       # (4*c2, 4*c3p)
    wb4 = _weight_to_parity_cols(w4, c4p)                       # (4*c3, 4*c4p)

    # Layer 1: ConvT(nz,c1,4,1,0) on a 1x1 input == matmul; BN stats fused as epilogue.
    cols1, s1, q1 = pallas_matmul_stats(x2d, wb1)               # (nb, 16*c1) bf16
    sc1, sh1 = _bn_scale_shift(s1.reshape(16, c1).sum(0), q1.reshape(16, c1).sum(0),
                               nb * 16.0, params["g1"], params["b1"])

    # Layer 2: BN1+ReLU folded into the im2col gather; one K = 4*c1 parity matmul.
    a2 = _act_im2col(cols1.reshape(nb, 4, 4, c1), sc1, sh1)     # (nb*25, 4*c1) bf16
    y2 = _parity_to_image(pallas_matmul(a2, wb2), nb, 4, 4, c2) # (nb, 8, 8, c2) bf16
    y2f = y2.astype(jnp.float32)                                # stats fuse into the
    sc2, sh2 = _bn_scale_shift(jnp.sum(y2f, (0, 1, 2)),         # depth-to-space fusion
                               jnp.sum(y2f * y2f, (0, 1, 2)),
                               nb * 64.0, params["g2"], params["b2"])

    # Layer 3
    a3 = _act_im2col(y2, sc2, sh2)                              # (nb*81, 4*c2)
    y3 = _parity_to_image(pallas_matmul(a3, wb3), nb, 8, 8, c3) # (nb, 16, 16, c3)
    y3f = y3.astype(jnp.float32)
    sc3, sh3 = _bn_scale_shift(jnp.sum(y3f, (0, 1, 2)),
                               jnp.sum(y3f * y3f, (0, 1, 2)),
                               nb * 256.0, params["g3"], params["b3"])

    # Layer 4: lane-padded (4*c4p = 128 lanes) matmul with tanh fused in-kernel.
    a4 = _act_im2col(y3, sc3, sh3)                              # (nb*289, 4*c3)
    o4 = pallas_matmul(a4, wb4, fuse_tanh=True)                 # (nb*289, 4*c4p)
    y4 = _parity_to_image(o4, nb, 16, 16, c4)                   # (nb, 32, 32, c4)
    return jnp.transpose(y4, (0, 3, 1, 2)).astype(jnp.float32)  # NHWC -> NCHW


# ------------------------------------------------------- pure-JAX reference ----
def _reference_forward(x_nchw, params, eps=1e-5):
    x = jnp.transpose(x_nchw, (0, 2, 3, 1)).astype(jnp.float32)

    def convT(x, w, s, p):
        k = w.shape[2]
        rhs = jnp.transpose(w[:, :, ::-1, ::-1], (2, 3, 0, 1))  # HWIO, flipped
        return jax.lax.conv_general_dilated(
            x, rhs, window_strides=(1, 1),
            padding=[(k - 1 - p, k - 1 - p)] * 2,
            lhs_dilation=(s, s),
            dimension_numbers=("NHWC", "HWIO", "NHWC"),
            precision=jax.lax.Precision.HIGHEST)

    def bn_relu(y, g, b):
        m = y.mean(axis=(0, 1, 2))
        v = y.var(axis=(0, 1, 2))
        return jnp.maximum((y - m) * jax.lax.rsqrt(v + eps) * g + b, 0.0)

    y = bn_relu(convT(x, params["w1"], 1, 0), params["g1"], params["b1"])
    y = bn_relu(convT(y, params["w2"], 2, 1), params["g2"], params["b2"])
    y = bn_relu(convT(y, params["w3"], 2, 1), params["g3"], params["b3"])
    y = jnp.tanh(convT(y, params["w4"], 2, 1))
    return jnp.transpose(y, (0, 3, 1, 2))


def init_params(key, nz, ngf, nc):
    k1, k2, k3, k4 = jax.random.split(key, 4)
    std = 0.02  # DCGAN-style init, deterministic via PRNGKey
    return dict(
        w1=jax.random.normal(k1, (nz, ngf * 4, 4, 4), jnp.float32) * std,
        g1=jnp.ones((ngf * 4,), jnp.float32), b1=jnp.zeros((ngf * 4,), jnp.float32),
        w2=jax.random.normal(k2, (ngf * 4, ngf * 2, 4, 4), jnp.float32) * std,
        g2=jnp.ones((ngf * 2,), jnp.float32), b2=jnp.zeros((ngf * 2,), jnp.float32),
        w3=jax.random.normal(k3, (ngf * 2, ngf, 4, 4), jnp.float32) * std,
        g3=jnp.ones((ngf,), jnp.float32), b3=jnp.zeros((ngf,), jnp.float32),
        w4=jax.random.normal(k4, (ngf, nc, 4, 4), jnp.float32) * std,
    )


if __name__ == "__main__":
    nz, ngf, nc, batch = 32, 16, 3, 2
    key = jax.random.PRNGKey(0)
    pkey, xkey = jax.random.split(key)
    params = init_params(pkey, nz, ngf, nc)
    x = jax.random.normal(xkey, (batch, nz, 1, 1), jnp.float32)  # DCGAN latent

    out = jax.block_until_ready(jax.jit(generator_forward)(x, params))

    assert out.shape == (batch, nc, 32, 32), out.shape
    assert bool(jnp.all(jnp.isfinite(out)))
    assert bool(jnp.all(jnp.abs(out) <= 1.0 + 1e-6))  # tanh output range

    ref = _reference_forward(x, params)
    max_err = float(jnp.max(jnp.abs(out - ref)))
    assert max_err < 1e-1, f"mismatch vs reference: {max_err}"

    print("KERNEL_OK")
</pallas_src>

<mosaic_0001>
module attributes {stable_mosaic.version = 11 : i64} {
  func.func @_mm_stats_kernel(%arg0: i32, %arg1: memref<2x32xf32, #tpu.memory_space<vmem>>, %arg2: memref<32x1024xbf16, #tpu.memory_space<vmem>>, %arg3: memref<2x1024xbf16, #tpu.memory_space<vmem>>, %arg4: memref<1x1024xf32, #tpu.memory_space<vmem>>, %arg5: memref<1x1024xf32, #tpu.memory_space<vmem>>) attributes {dimension_semantics = [#tpu.dimension_semantics<arbitrary>], iteration_bounds = array<i64: 1>, scalar_prefetch = 0 : i64, scratch_operands = 0 : i64, tpu.core_type = #tpu.core_type<tc>, window_params = [{transform_indices = @transform_0, window_bounds = array<i64: 2, 32>}, {pipeline_mode = #tpu.pipeline_mode<synchronous>, transform_indices = @transform_1, window_bounds = array<i64: 32, 1024>}, {transform_indices = @transform_2, window_bounds = array<i64: 2, 1024>}, {pipeline_mode = #tpu.pipeline_mode<synchronous>, transform_indices = @transform_3, window_bounds = array<i64: 1, 1024>}, {pipeline_mode = #tpu.pipeline_mode<synchronous>, transform_indices = @transform_4, window_bounds = array<i64: 1, 1024>}]} {
    %c0_i32 = arith.constant 0 : i32
    %0 = arith.cmpi eq, %arg0, %c0_i32 : i32
    %1 = arith.extui %0 : i1 to i32
    %c0_i32_0 = arith.constant 0 : i32
    %2 = arith.cmpi ne, %1, %c0_i32_0 : i32
    scf.if %2 {
      %cst_16 = arith.constant 0.000000e+00 : f32
      %20 = vector.broadcast %cst_16 : f32 to vector<1x1024xf32>
      %c0_17 = arith.constant 0 : index
      %c0_18 = arith.constant 0 : index
      %21 = vector.load %arg4[%c0_17, %c0_18] : memref<1x1024xf32, #tpu.memory_space<vmem>>, vector<1x1024xf32>
      tpu.vector_store %arg4[%c0_17, %c0_18], %20 {strides = array<i32>} : memref<1x1024xf32, #tpu.memory_space<vmem>>, vector<1x1024xf32>,
      %cst_19 = arith.constant 0.000000e+00 : f32
      %22 = vector.broadcast %cst_19 : f32 to vector<1x1024xf32>
      %c0_20 = arith.constant 0 : index
      %c0_21 = arith.constant 0 : index
      %23 = vector.load %arg5[%c0_20, %c0_21] : memref<1x1024xf32, #tpu.memory_space<vmem>>, vector<1x1024xf32>
      tpu.vector_store %arg5[%c0_20, %c0_21], %22 {strides = array<i32>} : memref<1x1024xf32, #tpu.memory_space<vmem>>, vector<1x1024xf32>,
    } else {
    }
    %c0 = arith.constant 0 : index
    %c0_1 = arith.constant 0 : index
    %3 = vector.load %arg1[%c0, %c0_1] : memref<2x32xf32, #tpu.memory_space<vmem>>, vector<2x32xf32>
    %4 = arith.truncf %3 : vector<2x32xf32> to vector<2x32xbf16>
    %c0_2 = arith.constant 0 : index
    %c0_3 = arith.constant 0 : index
    %5 = vector.load %arg2[%c0_2, %c0_3] : memref<32x1024xbf16, #tpu.memory_space<vmem>>, vector<32x1024xbf16>
    %cst = arith.constant dense<0.000000e+00> : vector<2x1024xf32>
    %6 = tpu.matmul %4, %5, %cst {dimension_numbers = #tpu.dot_dimension_numbers<[1], [0], [0], [1], [0, 0, 1, 1], [], []>} : vector<2x32xbf16>, vector<32x1024xbf16>, vector<2x1024xf32> -> vector<2x1024xf32>
    %c0_4 = arith.constant 0 : index
    %c0_5 = arith.constant 0 : index
    %7 = vector.load %arg4[%c0_4, %c0_5] : memref<1x1024xf32, #tpu.memory_space<vmem>>, vector<1x1024xf32>
    %cst_6 = arith.constant dense<0.000000e+00> : vector<1024xf32>
    %8 = vector.multi_reduction <add>, %6, %cst_6 [0] : vector<2x1024xf32> to vector<1024xf32>
    %9 = vector.shape_cast %8 : vector<1024xf32> to vector<1x1024xf32>
    %10 = arith.addf %7, %9 : vector<1x1024xf32>
    %c0_7 = arith.constant 0 : index
    %c0_8 = arith.constant 0 : index
    %11 = vector.load %arg4[%c0_7, %c0_8] : memref<1x1024xf32, #tpu.memory_space<vmem>>, vector<1x1024xf32>
    tpu.vector_store %arg4[%c0_7, %c0_8], %10 {strides = array<i32>} : memref<1x1024xf32, #tpu.memory_space<vmem>>, vector<1x1024xf32>,
    %c0_9 = arith.constant 0 : index
    %c0_10 = arith.constant 0 : index
    %12 = vector.load %arg5[%c0_9, %c0_10] : memref<1x1024xf32, #tpu.memory_space<vmem>>, vector<1x1024xf32>
    %13 = arith.mulf %6, %6 : vector<2x1024xf32>
    %cst_11 = arith.constant dense<0.000000e+00> : vector<1024xf32>
    %14 = vector.multi_reduction <add>, %13, %cst_11 [0] : vector<2x1024xf32> to vector<1024xf32>
    %15 = vector.shape_cast %14 : vector<1024xf32> to vector<1x1024xf32>
    %16 = arith.addf %12, %15 : vector<1x1024xf32>
    %c0_12 = arith.constant 0 : index
    %c0_13 = arith.constant 0 : index
    %17 = vector.load %arg5[%c0_12, %c0_13] : memref<1x1024xf32, #tpu.memory_space<vmem>>, vector<1x1024xf32>
    tpu.vector_store %arg5[%c0_12, %c0_13], %16 {strides = array<i32>} : memref<1x1024xf32, #tpu.memory_space<vmem>>, vector<1x1024xf32>,
    %18 = arith.truncf %6 : vector<2x1024xf32> to vector<2x1024xbf16>
    %c0_14 = arith.constant 0 : index
    %c0_15 = arith.constant 0 : index
    %19 = vector.load %arg3[%c0_14, %c0_15] : memref<2x1024xbf16, #tpu.memory_space<vmem>>, vector<2x1024xbf16>
    tpu.vector_store %arg3[%c0_14, %c0_15], %18 {strides = array<i32>} : memref<2x1024xbf16, #tpu.memory_space<vmem>>, vector<2x1024xbf16>,
    return
  }
  func.func @transform_0(%arg0: i32) -> (i32, i32) {
    %c0_i32 = arith.constant 0 : i32
    %c0_i32_0 = arith.constant 0 : i32
    return %arg0, %c0_i32 : i32, i32
  }
  func.func @transform_1(%arg0: i32) -> (i32, i32) {
    %c0_i32 = arith.constant 0 : i32
    %c0_i32_0 = arith.constant 0 : i32
    %c0_i32_1 = arith.constant 0 : i32
    return %c0_i32, %c0_i32_0 : i32, i32
  }
  func.func @transform_2(%arg0: i32) -> (i32, i32) {
    %c0_i32 = arith.constant 0 : i32
    %c0_i32_0 = arith.constant 0 : i32
    return %arg0, %c0_i32 : i32, i32
  }
  func.func @transform_3(%arg0: i32) -> (i32, i32) {
    %c0_i32 = arith.constant 0 : i32
    %c0_i32_0 = arith.constant 0 : i32
    %c0_i32_1 = arith.constant 0 : i32
    return %c0_i32, %c0_i32_0 : i32, i32
  }
  func.func @transform_4(%arg0: i32) -> (i32, i32) {
    %c0_i32 = arith.constant 0 : i32
    %c0_i32_0 = arith.constant 0 : i32
    %c0_i32_1 = arith.constant 0 : i32
    return %c0_i32, %c0_i32_0 : i32, i32
  }
}

module attributes {stable_mosaic.version = 11 : i64} {
  func.func @_mm_kernel(%arg0: i32, %arg1: memref<64x256xbf16, #tpu.memory_space<vmem>>, %arg2: memref<256x128xbf16, #tpu.memory_space<vmem>>, %arg3: memref<64x128xbf16, #tpu.memory_space<vmem>>) attributes {dimension_semantics = [#tpu.dimension_semantics<parallel>], iteration_bounds = array<i64: 1>, scalar_prefetch = 0 : i64, scratch_operands = 0 : i64, tpu.core_type = #tpu.core_type<tc>, window_params = [{transform_indices = @transform_0, window_bounds = array<i64: 64, 256>}, {pipeline_mode = #tpu.pipeline_mode<synchronous>, transform_indices = @transform_1, window_bounds = array<i64: 256, 128>}, {transform_indices = @transform_2, window_bounds = array<i64: 64, 128>}]} {
    %c0 = arith.constant 0 : index
    %c0_0 = arith.constant 0 : index
    %0 = vector.load %arg1[%c0, %c0_0] : memref<64x256xbf16, #tpu.memory_space<vmem>>, vector<64x256xbf16>
    %c0_1 = arith.constant 0 : index
    %c0_2 = arith.constant 0 : index
    %1 = vector.load %arg2[%c0_1, %c0_2] : memref<256x128xbf16, #tpu.memory_space<vmem>>, vector<256x128xbf16>
    %cst = arith.constant dense<0.000000e+00> : vector<64x128xf32>
    %2 = tpu.matmul %0, %1, %cst {dimension_numbers = #tpu.dot_dimension_numbers<[1], [0], [0], [1], [0, 0, 1, 1], [], []>} : vector<64x256xbf16>, vector<256x128xbf16>, vector<64x128xf32> -> vector<64x128xf32>
    %3 = arith.truncf %2 : vector<64x128xf32> to vector<64x128xbf16>
    %c0_3 = arith.constant 0 : index
    %c0_4 = arith.constant 0 : index
    %4 = vector.load %arg3[%c0_3, %c0_4] : memref<64x128xbf16, #tpu.memory_space<vmem>>, vector<64x128xbf16>
    tpu.vector_store %arg3[%c0_3, %c0_4], %3 {strides = array<i32>} : memref<64x128xbf16, #tpu.memory_space<vmem>>, vector<64x128xbf16>,
    return
  }
  func.func @transform_0(%arg0: i32) -> (i32, i32) {
    %c0_i32 = arith.constant 0 : i32
    %c0_i32_0 = arith.constant 0 : i32
    return %arg0, %c0_i32 : i32, i32
  }
  func.func @transform_1(%arg0: i32) -> (i32, i32) {
    %c0_i32 = arith.constant 0 : i32
    %c0_i32_0 = arith.constant 0 : i32
    %c0_i32_1 = arith.constant 0 : i32
    return %c0_i32, %c0_i32_0 : i32, i32
  }
  func.func @transform_2(%arg0: i32) -> (i32, i32) {
    %c0_i32 = arith.constant 0 : i32
    %c0_i32_0 = arith.constant 0 : i32
    return %arg0, %c0_i32 : i32, i32
  }
}

module attributes {stable_mosaic.version = 11 : i64} {
  func.func @_mm_kernel(%arg0: i32, %arg1: memref<176x128xbf16, #tpu.memory_space<vmem>>, %arg2: memref<128x128xbf16, #tpu.memory_space<vmem>>, %arg3: memref<176x128xbf16, #tpu.memory_space<vmem>>) attributes {dimension_semantics = [#tpu.dimension_semantics<parallel>], iteration_bounds = array<i64: 1>, scalar_prefetch = 0 : i64, scratch_operands = 0 : i64, tpu.core_type = #tpu.core_type<tc>, window_params = [{transform_indices = @transform_0, window_bounds = array<i64: 176, 128>}, {pipeline_mode = #tpu.pipeline_mode<synchronous>, transform_indices = @transform_1, window_bounds = array<i64: 128, 128>}, {transform_indices = @transform_2, window_bounds = array<i64: 176, 128>}]} {
    %c0 = arith.constant 0 : index
    %c0_0 = arith.constant 0 : index
    %0 = vector.load %arg1[%c0, %c0_0] : memref<176x128xbf16, #tpu.memory_space<vmem>>, vector<176x128xbf16>
    %c0_1 = arith.constant 0 : index
    %c0_2 = arith.constant 0 : index
    %1 = vector.load %arg2[%c0_1, %c0_2] : memref<128x128xbf16, #tpu.memory_space<vmem>>, vector<128x128xbf16>
    %cst = arith.constant dense<0.000000e+00> : vector<176x128xf32>
    %2 = tpu.matmul %0, %1, %cst {dimension_numbers = #tpu.dot_dimension_numbers<[1], [0], [0], [1], [0, 0, 1, 1], [], []>} : vector<176x128xbf16>, vector<128x128xbf16>, vector<176x128xf32> -> vector<176x128xf32>
    %3 = arith.truncf %2 : vector<176x128xf32> to vector<176x128xbf16>
    %c0_3 = arith.constant 0 : index
    %c0_4 = arith.constant 0 : index
    %4 = vector.load %arg3[%c0_3, %c0_4] : memref<176x128xbf16, #tpu.memory_space<vmem>>, vector<176x128xbf16>
    tpu.vector_store %arg3[%c0_3, %c0_4], %3 {strides = array<i32>} : memref<176x128xbf16, #tpu.memory_space<vmem>>, vector<176x128xbf16>,
    return
  }
  func.func @transform_0(%arg0: i32) -> (i32, i32) {
    %c0_i32 = arith.constant 0 : i32
    %c0_i32_0 = arith.constant 0 : i32
    return %arg0, %c0_i32 : i32, i32
  }
  func.func @transform_1(%arg0: i32) -> (i32, i32) {
    %c0_i32 = arith.constant 0 : i32
    %c0_i32_0 = arith.constant 0 : i32
    %c0_i32_1 = arith.constant 0 : i32
    return %c0_i32, %c0_i32_0 : i32, i32
  }
  func.func @transform_2(%arg0: i32) -> (i32, i32) {
    %c0_i32 = arith.constant 0 : i32
    %c0_i32_0 = arith.constant 0 : i32
    return %arg0, %c0_i32 : i32, i32
  }
}

module attributes {stable_mosaic.version = 11 : i64} {
  func.func @_mm_tanh_kernel(%arg0: i32, %arg1: memref<592x64xbf16, #tpu.memory_space<vmem>>, %arg2: memref<64x128xbf16, #tpu.memory_space<vmem>>, %arg3: memref<592x128xbf16, #tpu.memory_space<vmem>>) attributes {dimension_semantics = [#tpu.dimension_semantics<parallel>], iteration_bounds = array<i64: 1>, scalar_prefetch = 0 : i64, scratch_operands = 0 : i64, tpu.core_type = #tpu.core_type<tc>, window_params = [{transform_indices = @transform_0, window_bounds = array<i64: 592, 64>}, {pipeline_mode = #tpu.pipeline_mode<synchronous>, transform_indices = @transform_1, window_bounds = array<i64: 64, 128>}, {transform_indices = @transform_2, window_bounds = array<i64: 592, 128>}]} {
    %c0 = arith.constant 0 : index
    %c0_0 = arith.constant 0 : index
    %0 = vector.load %arg1[%c0, %c0_0] : memref<592x64xbf16, #tpu.memory_space<vmem>>, vector<592x64xbf16>
    %c0_1 = arith.constant 0 : index
    %c0_2 = arith.constant 0 : index
    %1 = vector.load %arg2[%c0_1, %c0_2] : memref<64x128xbf16, #tpu.memory_space<vmem>>, vector<64x128xbf16>
    %cst = arith.constant dense<0.000000e+00> : vector<592x128xf32>
    %2 = tpu.matmul %0, %1, %cst {dimension_numbers = #tpu.dot_dimension_numbers<[1], [0], [0], [1], [0, 0, 1, 1], [], []>} : vector<592x64xbf16>, vector<64x128xbf16>, vector<592x128xf32> -> vector<592x128xf32>
    %3 = math.tanh %2 : vector<592x128xf32>
    %4 = arith.truncf %3 : vector<592x128xf32> to vector<592x128xbf16>
    %c0_3 = arith.constant 0 : index
    %c0_4 = arith.constant 0 : index
    %5 = vector.load %arg3[%c0_3, %c0_4] : memref<592x128xbf16, #tpu.memory_space<vmem>>, vector<592x128xbf16>
    tpu.vector_store %arg3[%c0_3, %c0_4], %4 {strides = array<i32>} : memref<592x128xbf16, #tpu.memory_space<vmem>>, vector<592x128xbf16>,
    return
  }
  func.func @transform_0(%arg0: i32) -> (i32, i32) {
    %c0_i32 = arith.constant 0 : i32
    %c0_i32_0 = arith.constant 0 : i32
    return %arg0, %c0_i32 : i32, i32
  }
  func.func @transform_1(%arg0: i32) -> (i32, i32) {
    %c0_i32 = arith.constant 0 : i32
    %c0_i32_0 = arith.constant 0 : i32
    %c0_i32_1 = arith.constant 0 : i32
    return %c0_i32, %c0_i32_0 : i32, i32
  }
  func.func @transform_2(%arg0: i32) -> (i32, i32) {
    %c0_i32 = arith.constant 0 : i32
    %c0_i32_0 = arith.constant 0 : i32
    return %arg0, %c0_i32 : i32, i32
  }
}

</mosaic_0001>

<bundles_post_ra>
// kernel: squeeze.98
= control target key start
LH: loop header
LB: loop body
LE: loop exit
PB: predicated region body
PF: predicated region fallthrough
CT: control target
= control target key end

     0   :  { %vm3_vm0 = vcmask 523264   ;;  %s13_s9 = smov 64   ;;  %s33_s0 = inlined_call_operand.vmem [shape: f32[1024], index: 0, kind: input, shape index: {}]   ;;  %s34_s1 = inlined_call_operand.vmem [shape: f32[16,64], index: 1, kind: output, shape index: {}]  }
   0x1   :  { %v2_v0 = vld [vmem:[%s33_s0] sm:$0xff]  }
   0x2   :  { %4 = vst.msk [vmem:[%s34_s1] ss:$2 sm:$0xff] %vm3_vm0, %v2_v0   ;;  %6 = vrot.lane.b32.xlu0 %v2_v0, %s13_s9 }
  0x74   :  { %v7_v1 = vpop.permute.xlu0 %6  }
  0x75   :  { %11 = vst.msk [vmem:[%s34_s1 + $0x1] ss:$2 sm:$0xff] %vm3_vm0, %v7_v1  }

// kernel: generator_forward.4
= control target key start
LH: loop header
LB: loop body
LE: loop exit
PB: predicated region body
PF: predicated region fallthrough
CT: control target
= control target key end

     0   :  { %v636_v3 = vmov 0   ;;  %vm119_vm0 = vcmask 261120   ;;  %vm288_vm1 = vcmask 1041408   ;;  %v637_v54 = vmov 1966171168   ;;  %s829_s1 = inlined_call_operand.vmem [shape: bf16[32,1024], index: 1, kind: input, shape index: {}]   ;;  %s830_s0 = inlined_call_operand.vmem [shape: f32[2,32], index: 0, kind: input, shape index: {}]   ;;  %s831_s2 = inlined_call_operand.vmem [shape: bf16[2,1024], index: 2, kind: output, shape index: {0}]   ;;  %s832_s3 = inlined_call_operand.vmem [shape: f32[1,1024], index: 3, kind: output, shape index: {1}]   ;;  %s833_s4 = inlined_call_operand.vmem [shape: f32[1,1024], index: 4, kind: output, shape index: {2}]  }
   0x1   :  { %v31_v0 = vld [vmem:[%s829_s1 + $0x40] sm:$0xff]  ;;  %v32_v2 = vld [vmem:[%s829_s1 + $0x48] sm:$0xff]  ;;  %155 = vmatprep.mubr.bf16.mxu0 %v636_v3  ;;  %196 = vmatprep.mubr.bf16.mxu1 %v636_v3  ;;  %v33_v15 = vld [vmem:[%s829_s1 + $0x50] sm:$0xff]  ;;  %v358_v55 = vunpack.c.l.s4 %v637_v54  ;;  %v360_v56 = vlaneseq }
   0x2   :  { %v35_v1 = vld [vmem:[%s829_s1 + $0x60] sm:$0xff]  ;;  %v36_v5 = vld [vmem:[%s829_s1 + $0x68] sm:$0xff]  ;;  %v37_v16 = vld [vmem:[%s829_s1 + $0x70] sm:$0xff] }
   0x3   :  { %v618_v4 = vcombine.high %v31_v0, %v35_v1  ;;  %v617_v6 = vcombine.low %v31_v0, %v35_v1  ;;  %v23_v7 = vld [vmem:[%s829_s1] sm:$0xff]  ;;  %v620_v9 = vcombine.high %v32_v2, %v36_v5  ;;  %v619_v10 = vcombine.low %v32_v2, %v36_v5  ;;  %v24_v12 = vld [vmem:[%s829_s1 + $0x8] sm:$0xff]  ;;  %v34_v17 = vld [vmem:[%s829_s1 + $0x58] sm:$0xff] }
   0x4   :  { %v27_v8 = vld [vmem:[%s829_s1 + $0x20] sm:$0xff]  ;;  %v28_v13 = vld [vmem:[%s829_s1 + $0x28] sm:$0xff]  ;;  %v38_v20 = vld [vmem:[%s829_s1 + $0x78] sm:$0xff]  ;;  %v622_v22 = vcombine.high %v33_v15, %v37_v16  ;;  %v621_v29 = vcombine.low %v33_v15, %v37_v16 }
   0x5   :  { %v610_v11 = vcombine.high %v23_v7, %v27_v8  ;;  %135 = vmatprep.subr.bf16.mxu0 %v618_v4  ;;  %v612_v14 = vcombine.high %v24_v12, %v28_v13  ;;  %176 = vmatprep.subr.bf16.mxu1 %v620_v9  ;;  %v609_v18 = vcombine.low %v23_v7, %v27_v8  ;;  %v21_v19 = vld [vmem:[%s830_s0] sm:$0x3]  ;;  %v25_v24 = vld [vmem:[%s829_s1 + $0x10] sm:$0xff]  ;;  %v26_v27 = vld [vmem:[%s829_s1 + $0x18] sm:$0xff]  ;;  %v361_v7 = vshrl.u32 %v360_v56, 7 }
   0x6   :  { %136 = vmatpush1.bf16.msra.mxu0 %v617_v6  ;;  %177 = vmatpush1.bf16.msra.mxu1 %v619_v10  ;;  %v611_v21 = vcombine.low %v24_v12, %v28_v13  ;;  %v624_v23 = vcombine.high %v34_v17, %v38_v20  ;;  %v29_v25 = vld [vmem:[%s829_s1 + $0x30] sm:$0xff]  ;;  %v22_v26 = vpack.c.bf16 %v21_v19, %v21_v19  ;;  %v30_v28 = vld [vmem:[%s829_s1 + $0x38] sm:$0xff]  ;;  %v359_v6 = vunpack.c.0.s8 %v358_v55 }
   0x7   :  { %137 = vmatprep.subr.bf16.mxu0 %v610_v11  ;;  %178 = vmatprep.subr.bf16.mxu1 %v612_v14  ;;  %v623_v30 = vcombine.low %v34_v17, %v38_v20  ;;  %v614_v31 = vcombine.high %v25_v24, %v29_v25  ;;  %v616_v32 = vcombine.high %v26_v27, %v30_v28 }
   0x8   :  { %v613_v33 = vcombine.low %v25_v24, %v29_v25  ;;  %v615_v34 = vcombine.low %v26_v27, %v30_v28  ;;  %v754_v20 = vsub.s32 %v359_v6, %v361_v7 }
   0xa   :  { %138 = vmatpush1.bf16.msra.mxu0 %v609_v18  ;;  %179 = vmatpush1.bf16.msra.mxu1 %v611_v21 }
   0xb   :  { %217 = vmatprep.subr.bf16.mxu0 %v622_v22  ;;  %258 = vmatprep.subr.bf16.mxu1 %v624_v23 }
   0xd   :  { %625 = vmatmul.mubr.msk.bf16.vlgmr.msra.gmra.mxu0 %vm119_vm0, %v22_v26  ;;  %626 = vmatmul.mubr.msk.bf16.vlgmr.msra.gmra.mxu1 %vm119_vm0, %v22_v26 }
   0xe   :  { %218 = vmatpush1.bf16.msra.mxu0 %v621_v29  ;;  %259 = vmatpush1.bf16.msra.mxu1 %v623_v30 }
   0xf   :  { %219 = vmatprep.subr.bf16.mxu0 %v614_v31  ;;  %260 = vmatprep.subr.bf16.mxu1 %v616_v32 }
  0x10   :  { %237 = vmatprep.mubr.bf16.mxu0 %v636_v3  ;;  %278 = vmatprep.mubr.bf16.mxu1 %v636_v3 }
  0x12   :  { %220 = vmatpush1.bf16.msra.mxu0 %v613_v33  ;;  %261 = vmatpush1.bf16.msra.mxu1 %v615_v34 }
  0x15   :  { %627 = vmatmul.mubr.msk.bf16.vlgmr.msra.gmra.mxu0 %vm119_vm0, %v22_v26  ;;  %628 = vmatmul.mubr.msk.bf16.vlgmr.msra.gmra.mxu1 %vm119_vm0, %v22_v26 }
  0xcd   :  { %v718_v35 = vpop.f32.mrf.mxu0  ;;  %v724_v38 = vpop.f32.mrf.mxu1 }
  0xce   :  { %v289_v36 = vsel %vm288_vm1, %v718_v35, 0.0  ;;  %v406_v37 = vmul.f32 %v718_v35, %v718_v35  ;;  %v303_v40 = vsel %vm288_vm1, %v724_v38, 0.0  ;;  %v408_v41 = vmul.f32 %v724_v38, %v724_v38 }
  0xcf   :  { %v290_v39 = vrot.slane %v289_v36, 4  ;;  %v730_v42 = vpop.f32.mrf.mxu0  ;;  %v304_v44 = vrot.slane %v303_v40, 4  ;;  %v735_v46 = vpop.f32.mrf.mxu1 }
  0xd0   :  { %v414_v43 = vsel %vm288_vm1, %v406_v37, 0.0  ;;  %v296_v45 = vsel %vm288_vm1, %v730_v42, 0.0  ;;  %v428_v48 = vsel %vm288_vm1, %v408_v41, 0.0  ;;  %v407_v50 = vmul.f32 %v730_v42, %v730_v42 }
  0xd1   :  { %v291_v47 = vadd.f32 %v290_v39, %v289_v36  ;;  %v297_v49 = vrot.slane %v296_v45, 4  ;;  %v161_v51 = vpop.f32.mrf.mxu0  ;;  %v415_v52 = vrot.slane %v414_v43, 4  ;;  %v202_v53 = vpop.f32.mrf.mxu1  ;;  %v429_v58 = vrot.slane %v428_v48, 4 }
  0xd2   :  { %v310_v59 = vsel %vm288_vm1, %v735_v46, 0.0  ;;  %v305_v62 = vadd.f32 %v304_v44, %v303_v40  ;;  %v421_v0 = vsel %vm288_vm1, %v407_v50, 0.0  ;;  %v409_v4 = vmul.f32 %v735_v46, %v735_v46 }
  0xd3   :  { %v162_v57 = vpop.f32.mrf.mxu0  ;;  %v203_v60 = vpop.f32.mrf.mxu1  ;;  %v292_v61 = vrot.slane %v291_v47, 2  ;;  %v298_v63 = vadd.f32 %v297_v49, %v296_v45  ;;  %v416_v2 = vadd.f32 %v415_v52, %v414_v43  ;;  %v311_v3 = vrot.slane %v310_v59, 4 }
  0xd4   :  { %v430_v9 = vadd.f32 %v429_v58, %v428_v48  ;;  %v422_v10 = vrot.slane %v421_v0, 4  ;;  %v435_v11 = vsel %vm288_vm1, %v409_v4, 0.0  ;;  %v306_v14 = vrot.slane %v305_v62, 2 }
  0xd5   :  { %v743_v1 = vpop.f32.mrf.mxu0  ;;  %v747_v5 = vpop.f32.mrf.mxu1  ;;  %v293_v13 = vadd.f32 %v292_v61, %v291_v47  ;;  %v299_v15 = vrot.slane %v298_v63, 2  ;;  %v417_v17 = vrot.slane %v416_v2, 2  ;;  %v312_v18 = vadd.f32 %v311_v3, %v310_v59 }
  0xd6   :  { %v436_v21 = vrot.slane %v435_v11, 4  ;;  %v431_v23 = vrot.slane %v430_v9, 2  ;;  %v423_v24 = vadd.f32 %v422_v10, %v421_v0  ;;  %v629_v25 = vpack.c.bf16 %v730_v42, %v718_v35 }
  0xd7   :  { %v749_v8 = vpop.f32.mrf.mxu0  ;;  %v752_v12 = vpop.f32.mrf.mxu1  ;;  %v317_v26 = vsel %vm288_vm1, %v743_v1, 0.0  ;;  %v294_v28 = vrot.slane %v293_v13, 1  ;;  %v307_v29 = vadd.f32 %v306_v14, %v305_v62  ;;  %v300_v30 = vadd.f32 %v299_v15, %v298_v63 }
  0xd8   :  { %v318_v31 = vrot.slane %v317_v26, 4  ;;  %v418_v32 = vadd.f32 %v417_v17, %v416_v2  ;;  %v313_v33 = vrot.slane %v312_v18, 2  ;;  %v410_v34 = vmul.f32 %v743_v1, %v743_v1 }
  0xd9   :  { %v243_v16 = vpop.f32.mrf.mxu0  ;;  %v284_v19 = vpop.f32.mrf.mxu1  ;;  %v437_v36 = vadd.f32 %v436_v21, %v435_v11  ;;  %v331_v39 = vsel %vm288_vm1, %v747_v5, 0.0  ;;  %v432_v40 = vadd.f32 %v431_v23, %v430_v9  ;;  %v424_v35 = vrot.slane %v423_v24, 2 }
  0xda   :  { %v319_v37 = vadd.f32 %v318_v31, %v317_v26  ;;  %v765_v41 = vrot.slane %v629_v25, %v754_v20  ;;  %v442_v42 = vsel %vm288_vm1, %v410_v34, 0.0  ;;  %v768_v43 = vadd.f32 %v294_v28, %v293_v13 }
  0xdb   :  { %v244_v22 = vpop.f32.mrf.mxu0  ;;  %v285_v27 = vpop.f32.mrf.mxu1  ;;  %v308_v44 = vrot.slane %v307_v29, 1  ;;  %v301_v45 = vrot.slane %v300_v30, 1  ;;  %v443_v47 = vrot.slane %v442_v42, 4  ;;  %v419_v48 = vrot.slane %v418_v32, 1 }
  0xdc   :  { %v314_v49 = vadd.f32 %v313_v33, %v312_v18  ;;  %v332_v50 = vrot.slane %v331_v39, 4  ;;  %v412_v51 = vmul.f32 %v747_v5, %v747_v5  ;;  %v438_v52 = vrot.slane %v437_v36, 2 }
  0xdd   :  { %v320_v53 = vrot.slane %v319_v37, 2  ;;  %v324_v54 = vsel %vm288_vm1, %v749_v8, 0.0  ;;  %v411_v55 = vmul.f32 %v749_v8, %v749_v8  ;;  %v433_v56 = vrot.slane %v432_v40, 1 }
  0xde   :  { %v425_v57 = vadd.f32 %v424_v35, %v423_v24  ;;  %v444_v58 = vadd.f32 %v443_v47, %v442_v42  ;;  %v456_v59 = vsel %vm288_vm1, %v412_v51, 0.0  ;;  %v777_v60 = vadd.f32 %v308_v44, %v307_v29 }
  0xdf   :  { %v779_v61 = vadd.f32 %v301_v45, %v300_v30  ;;  %v457_v62 = vrot.slane %v456_v59, 4  ;;  %v325_v63 = vrot.slane %v324_v54, 4  ;;  %v781_v0 = vadd.f32 %v419_v48, %v418_v32 }
  0xe0   :  { %v630_v2 = vpack.c.bf16 %v735_v46, %v724_v38  ;;  %v333_v3 = vadd.f32 %v332_v50, %v331_v39  ;;  %v449_v4 = vsel %vm288_vm1, %v411_v55, 0.0  ;;  %v315_v6 = vrot.slane %v314_v49, 1 }
  0xe1   :  { %v439_v7 = vadd.f32 %v438_v52, %v437_v36  ;;  %v321_v9 = vadd.f32 %v320_v53, %v319_v37  ;;  %v326_v10 = vadd.f32 %v325_v63, %v324_v54  ;;  %v786_v11 = vadd.f32 %v433_v56, %v432_v40 }
  0xe2   :  { %v426_v13 = vrot.slane %v425_v57, 1  ;;  %v445_v14 = vrot.slane %v444_v58, 2  ;;  %v450_v15 = vrot.slane %v449_v4, 4  ;;  %v353_v16 = vcombine.low %v768_v43, %v779_v61 }
  0xe3   :  { %v458_v17 = vadd.f32 %v457_v62, %v456_v59  ;;  %v327_v18 = vrot.slane %v326_v10, 2  ;;  %v631_v38 = vpack.c.bf16 %v749_v8, %v743_v1  ;;  %v563_v46 = vrot.slane %v630_v2, %v754_v20 }
  0xe4   :  { %v334_v19 = vrot.slane %v333_v3, 2  ;;  %v451_v21 = vadd.f32 %v450_v15, %v449_v4  ;;  %v338_v22 = vsel %vm288_vm1, %v752_v12, 0.0  ;;  %v316_v23 = vadd.f32 %v315_v6, %v314_v49 }
  0xe5   :  { %v440_v24 = vrot.slane %v439_v7, 1  ;;  %v322_v25 = vrot.slane %v321_v9, 1  ;;  %v328_v26 = vadd.f32 %v327_v18, %v326_v10  ;;  %v446_v27 = vadd.f32 %v445_v14, %v444_v58 }
  0xe6   :  { %v452_v28 = vrot.slane %v451_v21, 2  ;;  %v339_v29 = vrot.slane %v338_v22, 4  ;;  %v413_v30 = vmul.f32 %v752_v12, %v752_v12  ;;  %v459_v31 = vrot.slane %v458_v17, 2 }
  0xe7   :  { %v329_v32 = vrot.slane %v328_v26, 1  ;;  %v570_v1 = vrot.slane %v631_v38, %v754_v20  ;;  %v632_v8 = vpack.c.bf16 %v752_v12, %v747_v5  ;;  %v335_v33 = vadd.f32 %v334_v19, %v333_v3 }
  0xe8   :  { %v453_v34 = vadd.f32 %v452_v28, %v451_v21  ;;  %v340_v36 = vadd.f32 %v339_v29, %v338_v22  ;;  %v463_v37 = vsel %vm288_vm1, %v413_v30, 0.0  ;;  %v427_v39 = vadd.f32 %v426_v13, %v425_v57 }
  0xe9   :  { %v578_v40 = vcombine.low %v765_v41, %v563_v46  ;;  %v464_v35 = vrot.slane %v463_v37, 4  ;;  %v577_v42 = vrot.slane %v632_v8, %v754_v20  ;;  %v441_v43 = vadd.f32 %v440_v24, %v439_v7 }
  0xea   :  { %v330_v44 = vadd.f32 %v329_v32, %v328_v26  ;;  %v454_v45 = vrot.slane %v453_v34, 1  ;;  %v341_v47 = vrot.slane %v340_v36, 2  ;;  %v447_v48 = vrot.slane %v446_v27, 1 }
  0xeb   :  { %v460_v49 = vadd.f32 %v459_v31, %v458_v17  ;;  %v465_v50 = vadd.f32 %v464_v35, %v463_v37  ;;  %v579_v51 = vcombine.low %v570_v1, %v577_v42  ;;  %v354_v5 = vcombine.low %v777_v60, %v316_v23 }
  0xec   :  { %v323_v12 = vadd.f32 %v322_v25, %v321_v9  ;;  %v336_v52 = vrot.slane %v335_v33, 1  ;;  %v342_v53 = vadd.f32 %v341_v47, %v340_v36  ;;  %v586_v54 = vrot.slane %v578_v40, %v754_v20 }
  0xed   :  { %v455_v55 = vadd.f32 %v454_v45, %v453_v34  ;;  %v466_v41 = vrot.slane %v465_v50, 2  ;;  %v593_v56 = vrot.slane %v579_v51, %v754_v20  ;;  %v478_v57 = vcombine.low %v781_v0, %v427_v39 }
  0xee   :  { %v479_v58 = vcombine.low %v786_v11, %v441_v43  ;;  %v355_v59 = vcombine.low %v323_v12, %v330_v44  ;;  %v343_v61 = vrot.slane %v342_v53, 1  ;;  %v448_v62 = vadd.f32 %v447_v48, %v446_v27 }
  0xef   :  { %v461_v63 = vrot.slane %v460_v49, 1  ;;  %v467_v2 = vadd.f32 %v466_v41, %v465_v50  ;;  %v594_v3 = vcombine.low %v586_v54, %v593_v56  ;;  %v363_v60 = vrot.slane %v353_v16, %v754_v20 }
  0xf0   :  { %v370_v4 = vrot.slane %v354_v5, %v754_v20  ;;  %v337_v6 = vadd.f32 %v336_v52, %v335_v33  ;;  %v344_v7 = vadd.f32 %v343_v61, %v342_v53  ;;  %v480_v9 = vcombine.low %v448_v62, %v455_v55 }
  0xf1   :  { %v468_v10 = vrot.slane %v467_v2, 1  ;;  %596 = vst [vmem:[%s831_s2] sm:$0xff] %v594_v3  ;;  %v377_v0 = vrot.slane %v355_v59, %v754_v20  ;;  %v488_v13 = vrot.slane %v478_v57, %v754_v20  ;;  %v495_v14 = vrot.slane %v479_v58, %v754_v20 }
  0xf2   :  { %v356_v11 = vcombine.low %v337_v6, %v344_v7  ;;  %v462_v15 = vadd.f32 %v461_v63, %v460_v49  ;;  %v385_v16 = vcombine.low %v363_v60, %v370_v4  ;;  %v502_v38 = vrot.slane %v480_v9, %v754_v20 }
  0xf3   :  { %v469_v17 = vadd.f32 %v468_v10, %v467_v2  ;;  %v510_v21 = vcombine.low %v488_v13, %v495_v14 }
  0xf4   :  { %v384_v18 = vrot.slane %v356_v11, %v754_v20  ;;  %v393_v23 = vrot.slane %v385_v16, %v754_v20 }
  0xf5   :  { %v481_v46 = vcombine.low %v462_v15, %v469_v17  ;;  %v518_v27 = vrot.slane %v510_v21, %v754_v20 }
  0xf6   :  { %v386_v19 = vcombine.low %v377_v0, %v384_v18 }
  0xf7   :  { %v509_v22 = vrot.slane %v481_v46, %v754_v20 }
  0xf8   :  { %v400_v24 = vrot.slane %v386_v19, %v754_v20 }
  0xf9   :  { %v511_v25 = vcombine.low %v502_v38, %v509_v22 }
  0xfa   :  { %v401_v26 = vcombine.low %v393_v23, %v400_v24 }
  0xfb   :  { %v525_v28 = vrot.slane %v511_v25, %v754_v20 }
  0xfc   :  { %404 = vst [vmem:[%s832_s3] sm:$0xff] %v401_v26 }
  0xfd   :  { %v526_v29 = vcombine.low %v518_v27, %v525_v28 }
  0xff   :  { %529 = vst [vmem:[%s833_s4] sm:$0xff] %v526_v29 }

// kernel: generator_forward.5
= control target key start
LH: loop header
LB: loop body
LE: loop exit
PB: predicated region body
PF: predicated region fallthrough
CT: control target
= control target key end

     0   :  { %s543_s1 = inlined_call_operand.vmem [shape: bf16[256,128], index: 1, kind: input, shape index: {}]   ;;  %s544_s0 = inlined_call_operand.vmem [shape: bf16[64,256], index: 0, kind: input, shape index: {}]   ;;  %s545_s2 = inlined_call_operand.vmem [shape: bf16[64,128], index: 2, kind: output, shape index: {}]  }
   0x1   :  { %v416_v0 = vld [vmem:[%s543_s1 + $0x78] sm:$0xff]   ;;  %v418_v2 = vld [vmem:[%s543_s1 + $0x70] sm:$0xff]   ;;  %v420_v4 = vld [vmem:[%s543_s1 + $0x68] sm:$0xff]  }
   0x2   :  { %v417_v1 = vld [vmem:[%s543_s1 + $0x38] sm:$0xff]   ;;  %360 = vmatprep.subr.bf16.mxu0 %v416_v0  ;;  %400 = vmatprep.subr.bf16.mxu1 %v416_v0  ;;  %v419_v3 = vld [vmem:[%s543_s1 + $0x30] sm:$0xff]   ;;  %v421_v5 = vld [vmem:[%s543_s1 + $0x28] sm:$0xff]  }
   0x3   :  { %361 = vmatpush3.bf16.msra.mxu0 %v417_v1  ;;  %408 = vmatpush3.bf16.msra.mxu1 %v417_v1  ;;  %v422_v6 = vld [vmem:[%s543_s1 + $0x60] sm:$0xff]   ;;  %v424_v8 = vld [vmem:[%s543_s1 + $0x58] sm:$0xff]   ;;  %v426_v10 = vld [vmem:[%s543_s1 + $0x50] sm:$0xff]  }
   0x4   :  { %362 = vmatprep.subr.bf16.mxu0 %v418_v2  ;;  %401 = vmatprep.subr.bf16.mxu1 %v418_v2  ;;  %v423_v7 = vld [vmem:[%s543_s1 + $0x20] sm:$0xff]   ;;  %v425_v9 = vld [vmem:[%s543_s1 + $0x18] sm:$0xff]   ;;  %v427_v13 = vld [vmem:[%s543_s1 + $0x10] sm:$0xff]  }
   0x5   :  { %v434_v11 = vld [vmem:[%s544_s0 + $0x4] ss:$8 sps:$4 sm:$0xff]   ;;  %v432_v18 = vld [vmem:[%s544_s0] ss:$8 sps:$4 sm:$0xff]   ;;  %v438_v20 = vld [vmem:[%s544_s0 + $0x14] ss:$8 sps:$4 sm:$0xff]  }
   0x6   :  { %v437_v12 = vld [vmem:[%s544_s0 + $0x24] ss:$8 sps:$4 sm:$0xff]   ;;  %220 = vmatprep.mubr.bf16.mxu0 %v434_v11  ;;  %v435_v19 = vld [vmem:[%s544_s0 + $0x20] ss:$8 sps:$4 sm:$0xff]   ;;  %v440_v21 = vld [vmem:[%s544_s0 + $0x34] ss:$8 sps:$4 sm:$0xff]  }
   0x7   :  { %363 = vmatpush3.bf16.msra.mxu0 %v419_v3  ;;  %409 = vmatpush3.bf16.msra.mxu1 %v419_v3  ;;  %v428_v14 = vld [vmem:[%s543_s1 + $0x48] sm:$0xff]   ;;  %v430_v16 = vld [vmem:[%s543_s1 + $0x40] sm:$0xff]   ;;  %v442_v22 = vld [vmem:[%s544_s0 + $0x10] ss:$8 sps:$4 sm:$0xff]  }
   0x8   :  { %364 = vmatprep.subr.bf16.mxu0 %v420_v4  ;;  %402 = vmatprep.subr.bf16.mxu1 %v420_v4  ;;  %v429_v15 = vld [vmem:[%s543_s1 + $0x8] sm:$0xff]   ;;  %v431_v17 = vld [vmem:[%s543_s1] sm:$0xff]   ;;  %v443_v23 = vld [vmem:[%s544_s0 + $0x30] ss:$8 sps:$4 sm:$0xff]  }
   0x9   :  { %236 = vmatprep.mubr.bf16.mxu1 %v437_v12 }
   0xb   :  { %365 = vmatpush3.bf16.msra.mxu0 %v421_v5  ;;  %410 = vmatpush3.bf16.msra.mxu1 %v421_v5 }
   0xc   :  { %366 = vmatprep.subr.bf16.mxu0 %v422_v6  ;;  %403 = vmatprep.subr.bf16.mxu1 %v422_v6 }
   0xf   :  { %367 = vmatpush3.bf16.msra.mxu0 %v423_v7  ;;  %411 = vmatpush3.bf16.msra.mxu1 %v423_v7 }
  0x10   :  { %368 = vmatprep.subr.bf16.mxu0 %v424_v8  ;;  %404 = vmatprep.subr.bf16.mxu1 %v424_v8 }
  0x13   :  { %369 = vmatpush3.bf16.msra.mxu0 %v425_v9  ;;  %412 = vmatpush3.bf16.msra.mxu1 %v425_v9 }
  0x14   :  { %370 = vmatprep.subr.bf16.mxu0 %v426_v10  ;;  %405 = vmatprep.subr.bf16.mxu1 %v426_v10 }
  0x17   :  { %371 = vmatpush3.bf16.msra.mxu0 %v427_v13  ;;  %413 = vmatpush3.bf16.msra.mxu1 %v427_v13 }
  0x18   :  { %372 = vmatprep.subr.bf16.mxu0 %v428_v14  ;;  %406 = vmatprep.subr.bf16.mxu1 %v428_v14 }
  0x1b   :  { %373 = vmatpush3.bf16.msra.mxu0 %v429_v15  ;;  %414 = vmatpush3.bf16.msra.mxu1 %v429_v15 }
  0x1c   :  { %374 = vmatprep.subr.bf16.mxu0 %v430_v16  ;;  %407 = vmatprep.subr.bf16.mxu1 %v430_v16 }
  0x1f   :  { %375 = vmatpush3.bf16.msra.mxu0 %v431_v17  ;;  %415 = vmatpush3.bf16.msra.mxu1 %v431_v17 }
  0x22   :  { %221 = vmatmul.mubr.bf16.vlgmr.msra.gmra.mxu0 %v432_v18  ;;  %237 = vmatmul.mubr.bf16.vlgmr.msra.gmra.mxu1 %v435_v19 }
  0x23   :  { %228 = vmatprep.mubr.bf16.mxu0 %v438_v20  ;;  %244 = vmatprep.mubr.bf16.mxu1 %v440_v21 }
  0x2a   :  { %229 = vmatmul.mubr.bf16.gmra.mxu0 %v442_v22  ;;  %245 = vmatmul.mubr.bf16.gmra.mxu1 %v443_v23 }
  0xe2   :  { %v376_v24 = vpop.f32.mrf.mxu0  ;;  %v388_v25 = vpop.f32.mrf.mxu1 }
  0xe4   :  { %v377_v26 = vpop.f32.mrf.mxu0  ;;  %v389_v27 = vpop.f32.mrf.mxu1 }
  0xe5   :  { %v378_v32 = vadd.f32 %v377_v26, %v376_v24  ;;  %v390_v33 = vadd.f32 %v389_v27, %v388_v25 }
  0xe6   :  { %v379_v28 = vpop.f32.mrf.mxu0  ;;  %v391_v29 = vpop.f32.mrf.mxu1 }
  0xe8   :  { %v380_v30 = vpop.f32.mrf.mxu0  ;;  %v392_v31 = vpop.f32.mrf.mxu1 }
  0xe9   :  { %v381_v34 = vadd.f32 %v380_v30, %v379_v28  ;;  %v393_v35 = vadd.f32 %v392_v31, %v391_v29 }
  0xea   :  { %v382_v36 = vpop.f32.mrf.mxu0  ;;  %v394_v37 = vpop.f32.mrf.mxu1 }
  0xeb   :  { %v340_v38 = vpack.c.bf16 %v381_v34, %v378_v32  ;;  %v350_v39 = vpack.c.bf16 %v393_v35, %v390_v33 }
  0xec   :  { %v383_v40 = vpop.f32.mrf.mxu0  ;;  %v395_v41 = vpop.f32.mrf.mxu1 }
  0xed   :  { %341 = vst [vmem:[%s545_s2] sm:$0xff] %v340_v38   ;;  %358 = vst [vmem:[%s545_s2 + $0x10] sm:$0xff] %v350_v39   ;;  %v384_v46 = vadd.f32 %v383_v40, %v382_v36  ;;  %v396_v47 = vadd.f32 %v395_v41, %v394_v37 }
  0xee   :  { %v385_v42 = vpop.f32.mrf.mxu0  ;;  %v397_v43 = vpop.f32.mrf.mxu1 }
  0xf0   :  { %v386_v44 = vpop.f32.mrf.mxu0  ;;  %v398_v45 = vpop.f32.mrf.mxu1 }
  0xf1   :  { %v387_v48 = vadd.f32 %v386_v44, %v385_v42  ;;  %v399_v49 = vadd.f32 %v398_v45, %v397_v43 }
  0xf3   :  { %v345_v50 = vpack.c.bf16 %v387_v48, %v384_v46  ;;  %v355_v51 = vpack.c.bf16 %v399_v49, %v396_v47 }
  0xf5   :  { %357 = vst [vmem:[%s545_s2 + $0x8] sm:$0xff] %v345_v50   ;;  %359 = vst [vmem:[%s545_s2 + $0x18] sm:$0xff] %v355_v51  }

// kernel: generator_forward.6
= control target key start
LH: loop header
LB: loop body
LE: loop exit
PB: predicated region body
PF: predicated region fallthrough
CT: control target
= control target key end

     0   :  { %v643_v0 = vmov 0.0   ;;  %vm644_vm0 = vmmov 0   ;;  %s788_s1 = inlined_call_operand.vmem [shape: bf16[128,128], index: 1, kind: input, shape index: {}]   ;;  %s789_s0 = inlined_call_operand.vmem [shape: bf16[176,128], index: 0, kind: input, shape index: {}]   ;;  %s790_s2 = inlined_call_operand.vmem [shape: bf16[176,128], index: 2, kind: output, shape index: {}]  }
   0x1   :  { %546 = vmatprep.subr.bf16.mxu0 %v643_v0  ;;  %v624_v1 = vld [vmem:[%s788_s1 + $0x38] sm:$0xff]   ;;  %606 = vmatprep.subr.bf16.mxu1 %v643_v0  ;;  %v625_v2 = vld [vmem:[%s788_s1 + $0x30] sm:$0xff]   ;;  %v626_v3 = vld [vmem:[%s788_s1 + $0x28] sm:$0xff]  }
   0x2   :  { %562 = vmatprep.mubr.msk.bf16.mxu0 %vm644_vm0, %v643_v0  ;;  %586 = vmatprep.mubr.msk.bf16.mxu1 %vm644_vm0, %v643_v0  ;;  %v627_v4 = vld [vmem:[%s788_s1 + $0x20] sm:$0xff]   ;;  %v628_v5 = vld [vmem:[%s788_s1 + $0x18] sm:$0xff]   ;;  %v629_v6 = vld [vmem:[%s788_s1 + $0x10] sm:$0xff]  }
   0x3   :  { %547 = vmatpush3.bf16.msra.mxu0 %v624_v1  ;;  %614 = vmatpush3.bf16.msra.mxu1 %v624_v1  ;;  %v630_v7 = vld [vmem:[%s788_s1 + $0x8] sm:$0xff]   ;;  %v631_v8 = vld [vmem:[%s788_s1] sm:$0xff]   ;;  %v633_v10 = vld [vmem:[%s789_s0 + $0x30] sm:$0xff]  }
   0x4   :  { %548 = vmatprep.subr.bf16.mxu0 %v643_v0  ;;  %607 = vmatprep.subr.bf16.mxu1 %v643_v0  ;;  %v632_v9 = vld [vmem:[%s789_s0] sm:$0xff]   ;;  %v634_v11 = vld [vmem:[%s789_s0 + $0x8] sm:$0xff]   ;;  %v635_v12 = vld [vmem:[%s789_s0 + $0x38] sm:$0xff]  }
   0x5   :  { %v636_v13 = vld [vmem:[%s789_s0 + $0x10] sm:$0xff]   ;;  %v637_v14 = vld [vmem:[%s789_s0 + $0x40] sm:$0xff]   ;;  %v638_v15 = vld [vmem:[%s789_s0 + $0x18] sm:$0xff]  }
   0x6   :  { %v639_v16 = vld [vmem:[%s789_s0 + $0x48] sm:$0xff]   ;;  %v640_v17 = vld [vmem:[%s789_s0 + $0x20] sm:$0xff]   ;;  %v641_v18 = vld [vmem:[%s789_s0 + $0x50] sm:$0xff]  }
   0x7   :  { %549 = vmatpush3.bf16.msra.mxu0 %v625_v2  ;;  %615 = vmatpush3.bf16.msra.mxu1 %v625_v2  ;;  %v642_v19 = vld [vmem:[%s789_s0 + $0x28] sm:$0xff]  }
   0x8   :  { %550 = vmatprep.subr.bf16.mxu0 %v643_v0  ;;  %608 = vmatprep.subr.bf16.mxu1 %v643_v0 }
   0xb   :  { %551 = vmatpush3.bf16.msra.mxu0 %v626_v3  ;;  %616 = vmatpush3.bf16.msra.mxu1 %v626_v3 }
   0xc   :  { %552 = vmatprep.subr.bf16.mxu0 %v643_v0  ;;  %609 = vmatprep.subr.bf16.mxu1 %v643_v0 }
   0xf   :  { %553 = vmatpush3.bf16.msra.mxu0 %v627_v4  ;;  %617 = vmatpush3.bf16.msra.mxu1 %v627_v4 }
  0x10   :  { %554 = vmatprep.subr.bf16.mxu0 %v643_v0  ;;  %610 = vmatprep.subr.bf16.mxu1 %v643_v0 }
  0x13   :  { %555 = vmatpush3.bf16.msra.mxu0 %v628_v5  ;;  %618 = vmatpush3.bf16.msra.mxu1 %v628_v5 }
  0x14   :  { %556 = vmatprep.subr.bf16.mxu0 %v643_v0  ;;  %611 = vmatprep.subr.bf16.mxu1 %v643_v0 }
  0x17   :  { %557 = vmatpush3.bf16.msra.mxu0 %v629_v6  ;;  %619 = vmatpush3.bf16.msra.mxu1 %v629_v6 }
  0x18   :  { %558 = vmatprep.subr.bf16.mxu0 %v643_v0  ;;  %612 = vmatprep.subr.bf16.mxu1 %v643_v0 }
  0x1b   :  { %559 = vmatpush3.bf16.msra.mxu0 %v630_v7  ;;  %620 = vmatpush3.bf16.msra.mxu1 %v630_v7 }
  0x1c   :  { %560 = vmatprep.subr.bf16.mxu0 %v643_v0  ;;  %613 = vmatprep.subr.bf16.mxu1 %v643_v0 }
  0x1f   :  { %561 = vmatpush3.bf16.msra.mxu0 %v631_v8  ;;  %621 = vmatpush3.bf16.msra.mxu1 %v631_v8 }
  0x22   :  { %563 = vmatmul.mubr.bf16.vlgmr.msra.gmra.mxu0 %v632_v9  ;;  %587 = vmatmul.mubr.bf16.vlgmr.msra.gmra.mxu1 %v633_v10 }
  0x23   :  { %566 = vmatprep.mubr.msk.bf16.mxu0 %vm644_vm0, %v643_v0  ;;  %590 = vmatprep.mubr.msk.bf16.mxu1 %vm644_vm0, %v643_v0 }
  0x2a   :  { %567 = vmatmul.mubr.bf16.gmra.mxu0 %v634_v11  ;;  %591 = vmatmul.mubr.bf16.gmra.mxu1 %v635_v12 }
  0x2b   :  { %570 = vmatprep.mubr.msk.bf16.mxu0 %vm644_vm0, %v643_v0  ;;  %594 = vmatprep.mubr.msk.bf16.mxu1 %vm644_vm0, %v643_v0 }
  0x32   :  { %571 = vmatmul.mubr.bf16.gmra.mxu0 %v636_v13  ;;  %595 = vmatmul.mubr.bf16.gmra.mxu1 %v637_v14 }
  0x33   :  { %574 = vmatprep.mubr.msk.bf16.mxu0 %vm644_vm0, %v643_v0  ;;  %598 = vmatprep.mubr.msk.bf16.mxu1 %vm644_vm0, %v643_v0 }
  0x3a   :  { %575 = vmatmul.mubr.bf16.gmra.mxu0 %v638_v15  ;;  %599 = vmatmul.mubr.bf16.gmra.mxu1 %v639_v16 }
  0x3b   :  { %578 = vmatprep.mubr.msk.bf16.mxu0 %vm644_vm0, %v643_v0  ;;  %602 = vmatprep.mubr.msk.bf16.mxu1 %vm644_vm0, %v643_v0 }
  0x42   :  { %579 = vmatmul.mubr.bf16.gmra.mxu0 %v640_v17  ;;  %603 = vmatmul.mubr.bf16.gmra.mxu1 %v641_v18 }
  0x43   :  { %582 = vmatprep.mubr.msk.bf16.mxu0 %vm644_vm0, %v643_v0 }
  0x4a   :  { %583 = vmatmul.mubr.bf16.gmra.mxu0 %v642_v19 }
  0xe2   :  { %v198_v20 = vpop.f32.mrf.mxu0  ;;  %v246_v21 = vpop.f32.mrf.mxu1 }
  0xe4   :  { %v564_v22 = vpop.f32.mrf.mxu0  ;;  %v588_v23 = vpop.f32.mrf.mxu1 }
  0xe6   :  { %v201_v24 = vpop.f32.mrf.mxu0  ;;  %v249_v25 = vpop.f32.mrf.mxu1 }
  0xe7   :  { %v465_v26 = vpack.c.bf16 %v201_v24, %v198_v20  ;;  %v495_v27 = vpack.c.bf16 %v249_v25, %v246_v21 }
  0xe8   :  { %v565_v28 = vpop.f32.mrf.mxu0  ;;  %v589_v29 = vpop.f32.mrf.mxu1 }
  0xe9   :  { %466 = vst [vmem:[%s790_s2] sm:$0xff] %v465_v26   ;;  %522 = vst [vmem:[%s790_s2 + $0x30] sm:$0xff] %v495_v27  }
  0xea   :  { %v206_v30 = vpop.f32.mrf.mxu0  ;;  %v254_v31 = vpop.f32.mrf.mxu1 }
  0xec   :  { %v568_v32 = vpop.f32.mrf.mxu0  ;;  %v592_v33 = vpop.f32.mrf.mxu1 }
  0xee   :  { %v209_v34 = vpop.f32.mrf.mxu0  ;;  %v257_v35 = vpop.f32.mrf.mxu1 }
  0xef   :  { %v470_v36 = vpack.c.bf16 %v209_v34, %v206_v30  ;;  %v500_v37 = vpack.c.bf16 %v257_v35, %v254_v31 }
  0xf0   :  { %v569_v38 = vpop.f32.mrf.mxu0  ;;  %v593_v39 = vpop.f32.mrf.mxu1 }
  0xf1   :  { %517 = vst [vmem:[%s790_s2 + $0x8] sm:$0xff] %v470_v36   ;;  %523 = vst [vmem:[%s790_s2 + $0x38] sm:$0xff] %v500_v37  }
  0xf2   :  { %v214_v40 = vpop.f32.mrf.mxu0  ;;  %v262_v41 = vpop.f32.mrf.mxu1 }
  0xf4   :  { %v572_v42 = vpop.f32.mrf.mxu0  ;;  %v596_v43 = vpop.f32.mrf.mxu1 }
  0xf6   :  { %v217_v44 = vpop.f32.mrf.mxu0  ;;  %v265_v45 = vpop.f32.mrf.mxu1 }
  0xf7   :  { %v475_v46 = vpack.c.bf16 %v217_v44, %v214_v40  ;;  %v505_v47 = vpack.c.bf16 %v265_v45, %v262_v41 }
  0xf8   :  { %v573_v48 = vpop.f32.mrf.mxu0  ;;  %v597_v49 = vpop.f32.mrf.mxu1 }
  0xf9   :  { %518 = vst [vmem:[%s790_s2 + $0x10] sm:$0xff] %v475_v46   ;;  %524 = vst [vmem:[%s790_s2 + $0x40] sm:$0xff] %v505_v47  }
  0xfa   :  { %v222_v50 = vpop.f32.mrf.mxu0  ;;  %v270_v51 = vpop.f32.mrf.mxu1 }
  0xfc   :  { %v576_v52 = vpop.f32.mrf.mxu0  ;;  %v600_v53 = vpop.f32.mrf.mxu1 }
  0xfe   :  { %v225_v54 = vpop.f32.mrf.mxu0  ;;  %v273_v55 = vpop.f32.mrf.mxu1 }
  0xff   :  { %v480_v56 = vpack.c.bf16 %v225_v54, %v222_v50  ;;  %v510_v57 = vpack.c.bf16 %v273_v55, %v270_v51 }
 0x100   :  { %v577_v58 = vpop.f32.mrf.mxu0  ;;  %v601_v59 = vpop.f32.mrf.mxu1 }
 0x101   :  { %519 = vst [vmem:[%s790_s2 + $0x18] sm:$0xff] %v480_v56   ;;  %525 = vst [vmem:[%s790_s2 + $0x48] sm:$0xff] %v510_v57  }
 0x102   :  { %v230_v60 = vpop.f32.mrf.mxu0  ;;  %v278_v61 = vpop.f32.mrf.mxu1 }
 0x104   :  { %v580_v62 = vpop.f32.mrf.mxu0  ;;  %v604_v63 = vpop.f32.mrf.mxu1 }
 0x106   :  { %v233_v0 = vpop.f32.mrf.mxu0  ;;  %v281_v1 = vpop.f32.mrf.mxu1 }
 0x107   :  { %v485_v2 = vpack.c.bf16 %v233_v0, %v230_v60  ;;  %v515_v3 = vpack.c.bf16 %v281_v1, %v278_v61 }
 0x108   :  { %v581_v4 = vpop.f32.mrf.mxu0  ;;  %v605_v5 = vpop.f32.mrf.mxu1 }
 0x109   :  { %520 = vst [vmem:[%s790_s2 + $0x20] sm:$0xff] %v485_v2   ;;  %526 = vst [vmem:[%s790_s2 + $0x50] sm:$0xff] %v515_v3  }
 0x10a   :  { %v238_v6 = vpop.f32.mrf.mxu0 }
 0x10c   :  { %v584_v7 = vpop.f32.mrf.mxu0 }
 0x10e   :  { %v241_v8 = vpop.f32.mrf.mxu0 }
 0x10f   :  { %v490_v9 = vpack.c.bf16 %v241_v8, %v238_v6 }
 0x110   :  { %v585_v10 = vpop.f32.mrf.mxu0 }
 0x111   :  { %521 = vst [vmem:[%s790_s2 + $0x28] sm:$0xff] %v490_v9  }

// kernel: generator_forward.7
= control target key start
LH: loop header
LB: loop body
LE: loop exit
PB: predicated region body
PF: predicated region fallthrough
CT: control target
= control target key end

     0   :  { %v2035_v0 = vmov 0.0   ;;  %vm2036_vm0 = vmmov 0   ;;  %vm303_vm1 = vcmask 523264   ;;  %s2405_s1 = inlined_call_operand.vmem [shape: bf16[64,128], index: 1, kind: input, shape index: {}]   ;;  %s2406_s0 = inlined_call_operand.vmem [shape: bf16[592,64], index: 0, kind: input, shape index: {}]   ;;  %s2407_s2 = inlined_call_operand.vmem [shape: bf16[592,128], index: 2, kind: output, shape index: {}]  }
   0x1   :  { %1680 = vmatprep.subr.bf16.mxu0 %v2035_v0  ;;  %v1846_v1 = vld [vmem:[%s2405_s1 + $0x18] sm:$0xff]   ;;  %1836 = vmatprep.subr.bf16.mxu1 %v2035_v0  ;;  %v1847_v2 = vld [vmem:[%s2405_s1 + $0x10] sm:$0xff]   ;;  %v1848_v3 = vld [vmem:[%s2405_s1 + $0x8] sm:$0xff]  }
   0x2   :  { %1688 = vmatprep.mubr.msk.bf16.mxu0 %vm2036_vm0, %v2035_v0  ;;  %1764 = vmatprep.mubr.msk.bf16.mxu1 %vm2036_vm0, %v2035_v0  ;;  %v1849_v4 = vld [vmem:[%s2405_s1] sm:$0xff]   ;;  %v1851_v6 = vld [vmem:[%s2406_s0 + $0x98] sm:$0xff]   ;;  %v1852_v7 = vld [vmem:[%s2406_s0 + $0x8] sm:$0xff]  }
   0x3   :  { %1681 = vmatpush3.bf16.msra.mxu0 %v1846_v1  ;;  %1840 = vmatpush3.bf16.msra.mxu1 %v1846_v1  ;;  %v1850_v5 = vld [vmem:[%s2406_s0] sm:$0xff]   ;;  %v1854_v9 = vld [vmem:[%s2406_s0 + $0x10] sm:$0xff]   ;;  %v1855_v10 = vld [vmem:[%s2406_s0 + $0xa8] sm:$0xff]  }
   0x4   :  { %1682 = vmatprep.subr.bf16.mxu0 %v2035_v0  ;;  %1837 = vmatprep.subr.bf16.mxu1 %v2035_v0  ;;  %v1853_v8 = vld [vmem:[%s2406_s0 + $0xa0] sm:$0xff]   ;;  %v1856_v11 = vld [vmem:[%s2406_s0 + $0x18] sm:$0xff]   ;;  %v1857_v12 = vld [vmem:[%s2406_s0 + $0xb0] sm:$0xff]  }
   0x5   :  { %v1858_v13 = vld [vmem:[%s2406_s0 + $0x20] sm:$0xff]   ;;  %v1859_v14 = vld [vmem:[%s2406_s0 + $0xb8] sm:$0xff]   ;;  %v1860_v15 = vld [vmem:[%s2406_s0 + $0x28] sm:$0xff]  }
   0x6   :  { %v1861_v16 = vld [vmem:[%s2406_s0 + $0xc0] sm:$0xff]   ;;  %v1862_v17 = vld [vmem:[%s2406_s0 + $0x30] sm:$0xff]   ;;  %v1863_v18 = vld [vmem:[%s2406_s0 + $0xc8] sm:$0xff]  }
   0x7   :  { %1683 = vmatpush3.bf16.msra.mxu0 %v1847_v2  ;;  %1841 = vmatpush3.bf16.msra.mxu1 %v1847_v2  ;;  %v1864_v19 = vld [vmem:[%s2406_s0 + $0x38] sm:$0xff]   ;;  %v1865_v20 = vld [vmem:[%s2406_s0 + $0xd0] sm:$0xff]   ;;  %v1866_v21 = vld [vmem:[%s2406_s0 + $0x40] sm:$0xff]  }
   0x8   :  { %1684 = vmatprep.subr.bf16.mxu0 %v2035_v0  ;;  %1838 = vmatprep.subr.bf16.mxu1 %v2035_v0  ;;  %v1867_v22 = vld [vmem:[%s2406_s0 + $0xd8] sm:$0xff]   ;;  %v1868_v23 = vld [vmem:[%s2406_s0 + $0x48] sm:$0xff]   ;;  %v1869_v24 = vld [vmem:[%s2406_s0 + $0xe0] sm:$0xff]  }
   0x9   :  { %v1870_v25 = vld [vmem:[%s2406_s0 + $0x50] sm:$0xff]   ;;  %v1871_v26 = vld [vmem:[%s2406_s0 + $0xe8] sm:$0xff]   ;;  %v1872_v27 = vld [vmem:[%s2406_s0 + $0x58] sm:$0xff]  }
   0xa   :  { %v1873_v28 = vld [vmem:[%s2406_s0 + $0xf0] sm:$0xff]   ;;  %v1874_v29 = vld [vmem:[%s2406_s0 + $0x60] sm:$0xff]   ;;  %v1875_v30 = vld [vmem:[%s2406_s0 + $0xf8] sm:$0xff]  }
   0xb   :  { %1685 = vmatpush3.bf16.msra.mxu0 %v1848_v3  ;;  %1842 = vmatpush3.bf16.msra.mxu1 %v1848_v3  ;;  %v1876_v31 = vld [vmem:[%s2406_s0 + $0x68] sm:$0xff]   ;;  %v1877_v32 = vld [vmem:[%s2406_s0 + $0x100] sm:$0xff]   ;;  %v1878_v33 = vld [vmem:[%s2406_s0 + $0x70] sm:$0xff]  }
   0xc   :  { %1686 = vmatprep.subr.bf16.mxu0 %v2035_v0  ;;  %1839 = vmatprep.subr.bf16.mxu1 %v2035_v0  ;;  %v1879_v34 = vld [vmem:[%s2406_s0 + $0x108] sm:$0xff]   ;;  %v1880_v35 = vld [vmem:[%s2406_s0 + $0x78] sm:$0xff]   ;;  %v1881_v36 = vld [vmem:[%s2406_s0 + $0x110] sm:$0xff]  }
   0xd   :  { %v1882_v37 = vld [vmem:[%s2406_s0 + $0x80] sm:$0xff]   ;;  %v1883_v38 = vld [vmem:[%s2406_s0 + $0x118] sm:$0xff]   ;;  %v1884_v39 = vld [vmem:[%s2406_s0 + $0x88] sm:$0xff]  }
   0xe   :  { %v1885_v40 = vld [vmem:[%s2406_s0 + $0x120] sm:$0xff]   ;;  %v1886_v41 = vld [vmem:[%s2406_s0 + $0x90] sm:$0xff]  }
   0xf   :  { %1687 = vmatpush3.bf16.msra.mxu0 %v1849_v4  ;;  %1843 = vmatpush3.bf16.msra.mxu1 %v1849_v4 }
  0x12   :  { %1689 = vmatmul.mubr.msk.bf16.vlgmr.msra.gmra.mxu0 %vm303_vm1, %v1850_v5  ;;  %1765 = vmatmul.mubr.msk.bf16.vlgmr.msra.gmra.mxu1 %vm303_vm1, %v1851_v6 }
  0x13   :  { %1692 = vmatprep.mubr.msk.bf16.mxu0 %vm2036_vm0, %v2035_v0  ;;  %1768 = vmatprep.mubr.msk.bf16.mxu1 %vm2036_vm0, %v2035_v0 }
  0x1a   :  { %1693 = vmatmul.mubr.msk.bf16.gmra.mxu0 %vm303_vm1, %v1852_v7  ;;  %1769 = vmatmul.mubr.msk.bf16.gmra.mxu1 %vm303_vm1, %v1853_v8 }
  0x1b   :  { %1696 = vmatprep.mubr.msk.bf16.mxu0 %vm2036_vm0, %v2035_v0  ;;  %1772 = vmatprep.mubr.msk.bf16.mxu1 %vm2036_vm0, %v2035_v0 }
  0x22   :  { %1697 = vmatmul.mubr.msk.bf16.gmra.mxu0 %vm303_vm1, %v1854_v9  ;;  %1773 = vmatmul.mubr.msk.bf16.gmra.mxu1 %vm303_vm1, %v1855_v10 }
  0x23   :  { %1700 = vmatprep.mubr.msk.bf16.mxu0 %vm2036_vm0, %v2035_v0  ;;  %1776 = vmatprep.mubr.msk.bf16.mxu1 %vm2036_vm0, %v2035_v0 }
  0x2a   :  { %1701 = vmatmul.mubr.msk.bf16.gmra.mxu0 %vm303_vm1, %v1856_v11  ;;  %1777 = vmatmul.mubr.msk.bf16.gmra.mxu1 %vm303_vm1, %v1857_v12 }
  0x2b   :  { %1704 = vmatprep.mubr.msk.bf16.mxu0 %vm2036_vm0, %v2035_v0  ;;  %1780 = vmatprep.mubr.msk.bf16.mxu1 %vm2036_vm0, %v2035_v0 }
  0x32   :  { %1705 = vmatmul.mubr.msk.bf16.gmra.mxu0 %vm303_vm1, %v1858_v13  ;;  %1781 = vmatmul.mubr.msk.bf16.gmra.mxu1 %vm303_vm1, %v1859_v14 }
  0x33   :  { %1708 = vmatprep.mubr.msk.bf16.mxu0 %vm2036_vm0, %v2035_v0  ;;  %1784 = vmatprep.mubr.msk.bf16.mxu1 %vm2036_vm0, %v2035_v0 }
  0x3a   :  { %1709 = vmatmul.mubr.msk.bf16.gmra.mxu0 %vm303_vm1, %v1860_v15  ;;  %1785 = vmatmul.mubr.msk.bf16.gmra.mxu1 %vm303_vm1, %v1861_v16 }
  0x3b   :  { %1712 = vmatprep.mubr.msk.bf16.mxu0 %vm2036_vm0, %v2035_v0  ;;  %1788 = vmatprep.mubr.msk.bf16.mxu1 %vm2036_vm0, %v2035_v0 }
  0x42   :  { %1713 = vmatmul.mubr.msk.bf16.gmra.mxu0 %vm303_vm1, %v1862_v17  ;;  %1789 = vmatmul.mubr.msk.bf16.gmra.mxu1 %vm303_vm1, %v1863_v18 }
  0x43   :  { %1716 = vmatprep.mubr.msk.bf16.mxu0 %vm2036_vm0, %v2035_v0  ;;  %1792 = vmatprep.mubr.msk.bf16.mxu1 %vm2036_vm0, %v2035_v0 }
  0x4a   :  { %1717 = vmatmul.mubr.msk.bf16.gmra.mxu0 %vm303_vm1, %v1864_v19  ;;  %1793 = vmatmul.mubr.msk.bf16.gmra.mxu1 %vm303_vm1, %v1865_v20 }
  0x4b   :  { %1720 = vmatprep.mubr.msk.bf16.mxu0 %vm2036_vm0, %v2035_v0  ;;  %1796 = vmatprep.mubr.msk.bf16.mxu1 %vm2036_vm0, %v2035_v0 }
  0x52   :  { %1721 = vmatmul.mubr.msk.bf16.gmra.mxu0 %vm303_vm1, %v1866_v21  ;;  %1797 = vmatmul.mubr.msk.bf16.gmra.mxu1 %vm303_vm1, %v1867_v22 }
  0x53   :  { %1724 = vmatprep.mubr.msk.bf16.mxu0 %vm2036_vm0, %v2035_v0  ;;  %1800 = vmatprep.mubr.msk.bf16.mxu1 %vm2036_vm0, %v2035_v0 }
  0x5a   :  { %1725 = vmatmul.mubr.msk.bf16.gmra.mxu0 %vm303_vm1, %v1868_v23  ;;  %1801 = vmatmul.mubr.msk.bf16.gmra.mxu1 %vm303_vm1, %v1869_v24 }
  0x5b   :  { %1728 = vmatprep.mubr.msk.bf16.mxu0 %vm2036_vm0, %v2035_v0  ;;  %1804 = vmatprep.mubr.msk.bf16.mxu1 %vm2036_vm0, %v2035_v0 }
  0x62   :  { %1729 = vmatmul.mubr.msk.bf16.gmra.mxu0 %vm303_vm1, %v1870_v25  ;;  %1805 = vmatmul.mubr.msk.bf16.gmra.mxu1 %vm303_vm1, %v1871_v26 }
  0x63   :  { %1732 = vmatprep.mubr.msk.bf16.mxu0 %vm2036_vm0, %v2035_v0  ;;  %1808 = vmatprep.mubr.msk.bf16.mxu1 %vm2036_vm0, %v2035_v0 }
  0x6a   :  { %1733 = vmatmul.mubr.msk.bf16.gmra.mxu0 %vm303_vm1, %v1872_v27  ;;  %1809 = vmatmul.mubr.msk.bf16.gmra.mxu1 %vm303_vm1, %v1873_v28 }
  0x6b   :  { %1736 = vmatprep.mubr.msk.bf16.mxu0 %vm2036_vm0, %v2035_v0  ;;  %1812 = vmatprep.mubr.msk.bf16.mxu1 %vm2036_vm0, %v2035_v0 }
  0x72   :  { %1737 = vmatmul.mubr.msk.bf16.gmra.mxu0 %vm303_vm1, %v1874_v29  ;;  %1813 = vmatmul.mubr.msk.bf16.gmra.mxu1 %vm303_vm1, %v1875_v30 }
  0x73   :  { %1740 = vmatprep.mubr.msk.bf16.mxu0 %vm2036_vm0, %v2035_v0  ;;  %1816 = vmatprep.mubr.msk.bf16.mxu1 %vm2036_vm0, %v2035_v0 }
  0x7a   :  { %1741 = vmatmul.mubr.msk.bf16.gmra.mxu0 %vm303_vm1, %v1876_v31  ;;  %1817 = vmatmul.mubr.msk.bf16.gmra.mxu1 %vm303_vm1, %v1877_v32 }
  0x7b   :  { %1744 = vmatprep.mubr.msk.bf16.mxu0 %vm2036_vm0, %v2035_v0  ;;  %1820 = vmatprep.mubr.msk.bf16.mxu1 %vm2036_vm0, %v2035_v0 }
  0x82   :  { %1745 = vmatmul.mubr.msk.bf16.gmra.mxu0 %vm303_vm1, %v1878_v33  ;;  %1821 = vmatmul.mubr.msk.bf16.gmra.mxu1 %vm303_vm1, %v1879_v34 }
  0x83   :  { %1748 = vmatprep.mubr.msk.bf16.mxu0 %vm2036_vm0, %v2035_v0  ;;  %1824 = vmatprep.mubr.msk.bf16.mxu1 %vm2036_vm0, %v2035_v0 }
  0x8a   :  { %1749 = vmatmul.mubr.msk.bf16.gmra.mxu0 %vm303_vm1, %v1880_v35  ;;  %1825 = vmatmul.mubr.msk.bf16.gmra.mxu1 %vm303_vm1, %v1881_v36 }
  0x8b   :  { %1752 = vmatprep.mubr.msk.bf16.mxu0 %vm2036_vm0, %v2035_v0  ;;  %1828 = vmatprep.mubr.msk.bf16.mxu1 %vm2036_vm0, %v2035_v0 }
  0x92   :  { %1753 = vmatmul.mubr.msk.bf16.gmra.mxu0 %vm303_vm1, %v1882_v37  ;;  %1829 = vmatmul.mubr.msk.bf16.gmra.mxu1 %vm303_vm1, %v1883_v38 }
  0x93   :  { %1756 = vmatprep.mubr.msk.bf16.mxu0 %vm2036_vm0, %v2035_v0  ;;  %1832 = vmatprep.mubr.msk.bf16.mxu1 %vm2036_vm0, %v2035_v0 }
  0x9a   :  { %1757 = vmatmul.mubr.msk.bf16.gmra.mxu0 %vm303_vm1, %v1884_v39  ;;  %1833 = vmatmul.mubr.msk.bf16.gmra.mxu1 %vm303_vm1, %v1885_v40 }
  0x9b   :  { %1760 = vmatprep.mubr.msk.bf16.mxu0 %vm2036_vm0, %v2035_v0 }
  0xa2   :  { %1761 = vmatmul.mubr.msk.bf16.gmra.mxu0 %vm303_vm1, %v1886_v41 }
  0xd2   :  { %v449_v42 = vpop.f32.mrf.mxu0  ;;  %v601_v43 = vpop.f32.mrf.mxu1 }
  0xd3   :  { %1887 = vtanh.f32 %v449_v42 }
  0xd4   :  { %v1690_v44 = vpop.f32.mrf.mxu0  ;;  %v1766_v45 = vpop.f32.mrf.mxu1  ;;  %1889 = vtanh.f32 %v601_v43 }
  0xd6   :  { %v452_v46 = vpop.f32.mrf.mxu0  ;;  %v604_v47 = vpop.f32.mrf.mxu1 }
  0xd7   :  { %1891 = vtanh.f32 %v452_v46 }
  0xd8   :  { %v1691_v48 = vpop.f32.mrf.mxu0  ;;  %1893 = vtanh.f32 %v604_v47  ;;  %v1767_v49 = vpop.f32.mrf.mxu1 }
  0xda   :  { %v457_v50 = vpop.f32.mrf.mxu0  ;;  %v609_v51 = vpop.f32.mrf.mxu1 }
  0xdb   :  { %1895 = vtanh.f32 %v457_v50 }
  0xdc   :  { %v1694_v52 = vpop.f32.mrf.mxu0  ;;  %v1770_v53 = vpop.f32.mrf.mxu1  ;;  %1897 = vtanh.f32 %v609_v51 }
  0xde   :  { %v460_v54 = vpop.f32.mrf.mxu0  ;;  %v612_v55 = vpop.f32.mrf.mxu1 }
  0xdf   :  { %1899 = vtanh.f32 %v460_v54 }
  0xe0   :  { %v1695_v56 = vpop.f32.mrf.mxu0  ;;  %1901 = vtanh.f32 %v612_v55  ;;  %v1771_v57 = vpop.f32.mrf.mxu1 }
  0xe1   :  { %v1888_v58 = vpop.eup %1887 }
  0xe2   :  { %v465_v59 = vpop.f32.mrf.mxu0  ;;  %v617_v60 = vpop.f32.mrf.mxu1 }
  0xe3   :  { %v1890_v61 = vpop.eup %1889  ;;  %1903 = vtanh.f32 %v465_v59 }
  0xe4   :  { %v1892_v62 = vpop.eup %1891  ;;  %v1698_v63 = vpop.f32.mrf.mxu0  ;;  %1905 = vtanh.f32 %v617_v60 }
  0xe5   :  { %v1774_v0 = vpop.f32.mrf.mxu1  ;;  %v1894_v1 = vpop.eup %1893  ;;  %v1421_v2 = vpack.c.bf16 %v1892_v62, %v1888_v58 }
  0xe6   :  { %v1516_v3 = vpack.c.bf16 %v1894_v1, %v1890_v61  ;;  %v468_v4 = vpop.f32.mrf.mxu0 }
  0xe7   :  { %v620_v5 = vpop.f32.mrf.mxu1  ;;  %1422 = vst [vmem:[%s2407_s2] sm:$0xff] %v1421_v2   ;;  %1907 = vtanh.f32 %v468_v4 }
  0xe8   :  { %1621 = vst [vmem:[%s2407_s2 + $0x98] sm:$0xff] %v1516_v3   ;;  %v1699_v6 = vpop.f32.mrf.mxu0  ;;  %1909 = vtanh.f32 %v620_v5  ;;  %v1896_v8 = vpop.eup %1895 }
  0xe9   :  { %v1775_v7 = vpop.f32.mrf.mxu1  ;;  %v1898_v11 = vpop.eup %1897 }
  0xea   :  { %v473_v9 = vpop.f32.mrf.mxu0 }
  0xeb   :  { %v625_v10 = vpop.f32.mrf.mxu1  ;;  %1911 = vtanh.f32 %v473_v9 }
  0xec   :  { %v1900_v12 = vpop.eup %1899  ;;  %v1702_v13 = vpop.f32.mrf.mxu0  ;;  %1913 = vtanh.f32 %v625_v10 }
  0xed   :  { %v1778_v14 = vpop.f32.mrf.mxu1  ;;  %v1902_v15 = vpop.eup %1901  ;;  %v1426_v16 = vpack.c.bf16 %v1900_v12, %v1896_v8 }
  0xee   :  { %v1521_v17 = vpack.c.bf16 %v1902_v15, %v1898_v11  ;;  %v476_v18 = vpop.f32.mrf.mxu0 }
  0xef   :  { %v628_v19 = vpop.f32.mrf.mxu1  ;;  %1603 = vst [vmem:[%s2407_s2 + $0x8] sm:$0xff] %v1426_v16   ;;  %1915 = vtanh.f32 %v476_v18 }
  0xf0   :  { %1622 = vst [vmem:[%s2407_s2 + $0xa0] sm:$0xff] %v1521_v17   ;;  %v1703_v20 = vpop.f32.mrf.mxu0  ;;  %1917 = vtanh.f32 %v628_v19  ;;  %v1904_v22 = vpop.eup %1903 }
  0xf1   :  { %v1779_v21 = vpop.f32.mrf.mxu1  ;;  %v1906_v25 = vpop.eup %1905 }
  0xf2   :  { %v481_v23 = vpop.f32.mrf.mxu0 }
  0xf3   :  { %v633_v24 = vpop.f32.mrf.mxu1  ;;  %1919 = vtanh.f32 %v481_v23 }
  0xf4   :  { %v1908_v26 = vpop.eup %1907  ;;  %v1706_v27 = vpop.f32.mrf.mxu0  ;;  %1921 = vtanh.f32 %v633_v24 }
  0xf5   :  { %v1782_v28 = vpop.f32.mrf.mxu1  ;;  %v1910_v29 = vpop.eup %1909  ;;  %v1431_v30 = vpack.c.bf16 %v1908_v26, %v1904_v22 }
  0xf6   :  { %v1526_v31 = vpack.c.bf16 %v1910_v29, %v1906_v25  ;;  %v484_v32 = vpop.f32.mrf.mxu0 }
  0xf7   :  { %v636_v33 = vpop.f32.mrf.mxu1  ;;  %1604 = vst [vmem:[%s2407_s2 + $0x10] sm:$0xff] %v1431_v30   ;;  %1923 = vtanh.f32 %v484_v32 }
  0xf8   :  { %1623 = vst [vmem:[%s2407_s2 + $0xa8] sm:$0xff] %v1526_v31   ;;  %v1707_v34 = vpop.f32.mrf.mxu0  ;;  %1925 = vtanh.f32 %v636_v33  ;;  %v1912_v36 = vpop.eup %1911 }
  0xf9   :  { %v1783_v35 = vpop.f32.mrf.mxu1  ;;  %v1914_v39 = vpop.eup %1913 }
  0xfa   :  { %v489_v37 = vpop.f32.mrf.mxu0 }
  0xfb   :  { %v641_v38 = vpop.f32.mrf.mxu1  ;;  %1927 = vtanh.f32 %v489_v37 }
  0xfc   :  { %v1916_v40 = vpop.eup %1915  ;;  %v1710_v41 = vpop.f32.mrf.mxu0  ;;  %1929 = vtanh.f32 %v641_v38 }
  0xfd   :  { %v1786_v42 = vpop.f32.mrf.mxu1  ;;  %v1918_v43 = vpop.eup %1917  ;;  %v1436_v44 = vpack.c.bf16 %v1916_v40, %v1912_v36 }
  0xfe   :  { %v1531_v45 = vpack.c.bf16 %v1918_v43, %v1914_v39  ;;  %v492_v46 = vpop.f32.mrf.mxu0 }
  0xff   :  { %v644_v47 = vpop.f32.mrf.mxu1  ;;  %1605 = vst [vmem:[%s2407_s2 + $0x18] sm:$0xff] %v1436_v44   ;;  %1931 = vtanh.f32 %v492_v46 }
 0x100   :  { %1624 = vst [vmem:[%s2407_s2 + $0xb0] sm:$0xff] %v1531_v45   ;;  %v1711_v48 = vpop.f32.mrf.mxu0  ;;  %1933 = vtanh.f32 %v644_v47  ;;  %v1920_v50 = vpop.eup %1919 }
 0x101   :  { %v1787_v49 = vpop.f32.mrf.mxu1  ;;  %v1922_v53 = vpop.eup %1921 }
 0x102   :  { %v497_v51 = vpop.f32.mrf.mxu0 }
 0x103   :  { %v649_v52 = vpop.f32.mrf.mxu1  ;;  %1935 = vtanh.f32 %v497_v51 }
 0x104   :  { %v1924_v54 = vpop.eup %1923  ;;  %v1714_v55 = vpop.f32.mrf.mxu0  ;;  %1937 = vtanh.f32 %v649_v52 }
 0x105   :  { %v1790_v56 = vpop.f32.mrf.mxu1  ;;  %v1926_v57 = vpop.eup %1925  ;;  %v1441_v58 = vpack.c.bf16 %v1924_v54, %v1920_v50 }
 0x106   :  { %v1536_v59 = vpack.c.bf16 %v1926_v57, %v1922_v53  ;;  %v500_v60 = vpop.f32.mrf.mxu0 }
 0x107   :  { %v652_v61 = vpop.f32.mrf.mxu1  ;;  %1606 = vst [vmem:[%s2407_s2 + $0x20] sm:$0xff] %v1441_v58   ;;  %1939 = vtanh.f32 %v500_v60 }
 0x108   :  { %1625 = vst [vmem:[%s2407_s2 + $0xb8] sm:$0xff] %v1536_v59   ;;  %v1715_v62 = vpop.f32.mrf.mxu0  ;;  %1941 = vtanh.f32 %v652_v61  ;;  %v1928_v0 = vpop.eup %1927 }
 0x109   :  { %v1791_v63 = vpop.f32.mrf.mxu1  ;;  %v1930_v3 = vpop.eup %1929 }
 0x10a   :  { %v505_v1 = vpop.f32.mrf.mxu0 }
 0x10b   :  { %v657_v2 = vpop.f32.mrf.mxu1  ;;  %1943 = vtanh.f32 %v505_v1 }
 0x10c   :  { %v1932_v4 = vpop.eup %1931  ;;  %v1718_v5 = vpop.f32.mrf.mxu0  ;;  %1945 = vtanh.f32 %v657_v2 }
 0x10d   :  { %v1794_v6 = vpop.f32.mrf.mxu1  ;;  %v1934_v7 = vpop.eup %1933  ;;  %v1446_v8 = vpack.c.bf16 %v1932_v4, %v1928_v0 }
 0x10e   :  { %v1541_v9 = vpack.c.bf16 %v1934_v7, %v1930_v3  ;;  %v508_v10 = vpop.f32.mrf.mxu0 }
 0x10f   :  { %v660_v11 = vpop.f32.mrf.mxu1  ;;  %1607 = vst [vmem:[%s2407_s2 + $0x28] sm:$0xff] %v1446_v8   ;;  %1947 = vtanh.f32 %v508_v10 }
 0x110   :  { %1626 = vst [vmem:[%s2407_s2 + $0xc0] sm:$0xff] %v1541_v9   ;;  %v1719_v12 = vpop.f32.mrf.mxu0  ;;  %1949 = vtanh.f32 %v660_v11  ;;  %v1936_v14 = vpop.eup %1935 }
 0x111   :  { %v1795_v13 = vpop.f32.mrf.mxu1  ;;  %v1938_v17 = vpop.eup %1937 }
 0x112   :  { %v513_v15 = vpop.f32.mrf.mxu0 }
 0x113   :  { %v665_v16 = vpop.f32.mrf.mxu1  ;;  %1951 = vtanh.f32 %v513_v15 }
 0x114   :  { %v1940_v18 = vpop.eup %1939  ;;  %v1722_v19 = vpop.f32.mrf.mxu0  ;;  %1953 = vtanh.f32 %v665_v16 }
 0x115   :  { %v1798_v20 = vpop.f32.mrf.mxu1  ;;  %v1942_v21 = vpop.eup %1941  ;;  %v1451_v22 = vpack.c.bf16 %v1940_v18, %v1936_v14 }
 0x116   :  { %v1546_v23 = vpack.c.bf16 %v1942_v21, %v1938_v17  ;;  %v516_v24 = vpop.f32.mrf.mxu0 }
 0x117   :  { %v668_v25 = vpop.f32.mrf.mxu1  ;;  %1608 = vst [vmem:[%s2407_s2 + $0x30] sm:$0xff] %v1451_v22   ;;  %1955 = vtanh.f32 %v516_v24 }
 0x118   :  { %1627 = vst [vmem:[%s2407_s2 + $0xc8] sm:$0xff] %v1546_v23   ;;  %v1723_v26 = vpop.f32.mrf.mxu0  ;;  %1957 = vtanh.f32 %v668_v25  ;;  %v1944_v28 = vpop.eup %1943 }
 0x119   :  { %v1799_v27 = vpop.f32.mrf.mxu1  ;;  %v1946_v31 = vpop.eup %1945 }
 0x11a   :  { %v521_v29 = vpop.f32.mrf.mxu0 }
 0x11b   :  { %v673_v30 = vpop.f32.mrf.mxu1  ;;  %1959 = vtanh.f32 %v521_v29 }
 0x11c   :  { %v1948_v32 = vpop.eup %1947  ;;  %v1726_v33 = vpop.f32.mrf.mxu0  ;;  %1961 = vtanh.f32 %v673_v30 }
 0x11d   :  { %v1802_v34 = vpop.f32.mrf.mxu1  ;;  %v1950_v35 = vpop.eup %1949  ;;  %v1456_v36 = vpack.c.bf16 %v1948_v32, %v1944_v28 }
 0x11e   :  { %v1551_v37 = vpack.c.bf16 %v1950_v35, %v1946_v31  ;;  %v524_v38 = vpop.f32.mrf.mxu0 }
 0x11f   :  { %v676_v39 = vpop.f32.mrf.mxu1  ;;  %1609 = vst [vmem:[%s2407_s2 + $0x38] sm:$0xff] %v1456_v36   ;;  %1963 = vtanh.f32 %v524_v38 }
 0x120   :  { %1628 = vst [vmem:[%s2407_s2 + $0xd0] sm:$0xff] %v1551_v37   ;;  %v1727_v40 = vpop.f32.mrf.mxu0  ;;  %1965 = vtanh.f32 %v676_v39  ;;  %v1952_v42 = vpop.eup %1951 }
 0x121   :  { %v1803_v41 = vpop.f32.mrf.mxu1  ;;  %v1954_v45 = vpop.eup %1953 }
 0x122   :  { %v529_v43 = vpop.f32.mrf.mxu0 }
 0x123   :  { %v681_v44 = vpop.f32.mrf.mxu1  ;;  %1967 = vtanh.f32 %v529_v43 }
 0x124   :  { %v1956_v46 = vpop.eup %1955  ;;  %v1730_v47 = vpop.f32.mrf.mxu0  ;;  %1969 = vtanh.f32 %v681_v44 }
 0x125   :  { %v1806_v48 = vpop.f32.mrf.mxu1  ;;  %v1958_v49 = vpop.eup %1957  ;;  %v1461_v50 = vpack.c.bf16 %v1956_v46, %v1952_v42 }
 0x126   :  { %v1556_v51 = vpack.c.bf16 %v1958_v49, %v1954_v45  ;;  %v532_v52 = vpop.f32.mrf.mxu0 }
 0x127   :  { %v684_v53 = vpop.f32.mrf.mxu1  ;;  %1610 = vst [vmem:[%s2407_s2 + $0x40] sm:$0xff] %v1461_v50   ;;  %1971 = vtanh.f32 %v532_v52 }
 0x128   :  { %1629 = vst [vmem:[%s2407_s2 + $0xd8] sm:$0xff] %v1556_v51   ;;  %v1731_v54 = vpop.f32.mrf.mxu0  ;;  %1973 = vtanh.f32 %v684_v53  ;;  %v1960_v56 = vpop.eup %1959 }
 0x129   :  { %v1807_v55 = vpop.f32.mrf.mxu1  ;;  %v1962_v59 = vpop.eup %1961 }
 0x12a   :  { %v537_v57 = vpop.f32.mrf.mxu0 }
 0x12b   :  { %v689_v58 = vpop.f32.mrf.mxu1  ;;  %1975 = vtanh.f32 %v537_v57 }
 0x12c   :  { %v1964_v60 = vpop.eup %1963  ;;  %v1734_v61 = vpop.f32.mrf.mxu0  ;;  %1977 = vtanh.f32 %v689_v58 }
 0x12d   :  { %v1810_v62 = vpop.f32.mrf.mxu1  ;;  %v1966_v63 = vpop.eup %1965  ;;  %v1466_v0 = vpack.c.bf16 %v1964_v60, %v1960_v56 }
 0x12e   :  { %v1561_v1 = vpack.c.bf16 %v1966_v63, %v1962_v59  ;;  %v540_v2 = vpop.f32.mrf.mxu0 }
 0x12f   :  { %v692_v3 = vpop.f32.mrf.mxu1  ;;  %1611 = vst [vmem:[%s2407_s2 + $0x48] sm:$0xff] %v1466_v0   ;;  %1979 = vtanh.f32 %v540_v2 }
 0x130   :  { %1630 = vst [vmem:[%s2407_s2 + $0xe0] sm:$0xff] %v1561_v1   ;;  %v1735_v4 = vpop.f32.mrf.mxu0  ;;  %1981 = vtanh.f32 %v692_v3  ;;  %v1968_v6 = vpop.eup %1967 }
 0x131   :  { %v1811_v5 = vpop.f32.mrf.mxu1  ;;  %v1970_v9 = vpop.eup %1969 }
 0x132   :  { %v545_v7 = vpop.f32.mrf.mxu0 }
 0x133   :  { %v697_v8 = vpop.f32.mrf.mxu1  ;;  %1983 = vtanh.f32 %v545_v7 }
 0x134   :  { %v1972_v10 = vpop.eup %1971  ;;  %v1738_v11 = vpop.f32.mrf.mxu0  ;;  %1985 = vtanh.f32 %v697_v8 }
 0x135   :  { %v1814_v12 = vpop.f32.mrf.mxu1  ;;  %v1974_v13 = vpop.eup %1973  ;;  %v1471_v14 = vpack.c.bf16 %v1972_v10, %v1968_v6 }
 0x136   :  { %v1566_v15 = vpack.c.bf16 %v1974_v13, %v1970_v9  ;;  %v548_v16 = vpop.f32.mrf.mxu0 }
 0x137   :  { %v700_v17 = vpop.f32.mrf.mxu1  ;;  %1612 = vst [vmem:[%s2407_s2 + $0x50] sm:$0xff] %v1471_v14   ;;  %1987 = vtanh.f32 %v548_v16 }
 0x138   :  { %1631 = vst [vmem:[%s2407_s2 + $0xe8] sm:$0xff] %v1566_v15   ;;  %v1739_v18 = vpop.f32.mrf.mxu0  ;;  %1989 = vtanh.f32 %v700_v17  ;;  %v1976_v20 = vpop.eup %1975 }
 0x139   :  { %v1815_v19 = vpop.f32.mrf.mxu1  ;;  %v1978_v23 = vpop.eup %1977 }
 0x13a   :  { %v553_v21 = vpop.f32.mrf.mxu0 }
 0x13b   :  { %v705_v22 = vpop.f32.mrf.mxu1  ;;  %1991 = vtanh.f32 %v553_v21 }
 0x13c   :  { %v1980_v24 = vpop.eup %1979  ;;  %v1742_v25 = vpop.f32.mrf.mxu0  ;;  %1993 = vtanh.f32 %v705_v22 }
 0x13d   :  { %v1818_v26 = vpop.f32.mrf.mxu1  ;;  %v1982_v27 = vpop.eup %1981  ;;  %v1476_v28 = vpack.c.bf16 %v1980_v24, %v1976_v20 }
 0x13e   :  { %v1571_v29 = vpack.c.bf16 %v1982_v27, %v1978_v23  ;;  %v556_v30 = vpop.f32.mrf.mxu0 }
 0x13f   :  { %v708_v31 = vpop.f32.mrf.mxu1  ;;  %1613 = vst [vmem:[%s2407_s2 + $0x58] sm:$0xff] %v1476_v28   ;;  %1995 = vtanh.f32 %v556_v30 }
 0x140   :  { %1632 = vst [vmem:[%s2407_s2 + $0xf0] sm:$0xff] %v1571_v29   ;;  %v1743_v32 = vpop.f32.mrf.mxu0  ;;  %1997 = vtanh.f32 %v708_v31  ;;  %v1984_v34 = vpop.eup %1983 }
 0x141   :  { %v1819_v33 = vpop.f32.mrf.mxu1  ;;  %v1986_v37 = vpop.eup %1985 }
 0x142   :  { %v561_v35 = vpop.f32.mrf.mxu0 }
 0x143   :  { %v713_v36 = vpop.f32.mrf.mxu1  ;;  %1999 = vtanh.f32 %v561_v35 }
 0x144   :  { %v1988_v38 = vpop.eup %1987  ;;  %v1746_v39 = vpop.f32.mrf.mxu0  ;;  %2001 = vtanh.f32 %v713_v36 }
 0x145   :  { %v1822_v40 = vpop.f32.mrf.mxu1  ;;  %v1990_v41 = vpop.eup %1989  ;;  %v1481_v42 = vpack.c.bf16 %v1988_v38, %v1984_v34 }
 0x146   :  { %v1576_v43 = vpack.c.bf16 %v1990_v41, %v1986_v37  ;;  %v564_v44 = vpop.f32.mrf.mxu0 }
 0x147   :  { %v716_v45 = vpop.f32.mrf.mxu1  ;;  %1614 = vst [vmem:[%s2407_s2 + $0x60] sm:$0xff] %v1481_v42   ;;  %2003 = vtanh.f32 %v564_v44 }
 0x148   :  { %1633 = vst [vmem:[%s2407_s2 + $0xf8] sm:$0xff] %v1576_v43   ;;  %v1747_v46 = vpop.f32.mrf.mxu0  ;;  %2005 = vtanh.f32 %v716_v45  ;;  %v1992_v48 = vpop.eup %1991 }
 0x149   :  { %v1823_v47 = vpop.f32.mrf.mxu1  ;;  %v1994_v51 = vpop.eup %1993 }
 0x14a   :  { %v569_v49 = vpop.f32.mrf.mxu0 }
 0x14b   :  { %v721_v50 = vpop.f32.mrf.mxu1  ;;  %2007 = vtanh.f32 %v569_v49 }
 0x14c   :  { %v1996_v52 = vpop.eup %1995  ;;  %v1750_v53 = vpop.f32.mrf.mxu0  ;;  %2009 = vtanh.f32 %v721_v50 }
 0x14d   :  { %v1826_v54 = vpop.f32.mrf.mxu1  ;;  %v1998_v55 = vpop.eup %1997  ;;  %v1486_v56 = vpack.c.bf16 %v1996_v52, %v1992_v48 }
 0x14e   :  { %v1581_v57 = vpack.c.bf16 %v1998_v55, %v1994_v51  ;;  %v572_v58 = vpop.f32.mrf.mxu0 }
 0x14f   :  { %v724_v59 = vpop.f32.mrf.mxu1  ;;  %1615 = vst [vmem:[%s2407_s2 + $0x68] sm:$0xff] %v1486_v56   ;;  %2011 = vtanh.f32 %v572_v58 }
 0x150   :  { %1634 = vst [vmem:[%s2407_s2 + $0x100] sm:$0xff] %v1581_v57   ;;  %v1751_v60 = vpop.f32.mrf.mxu0  ;;  %2013 = vtanh.f32 %v724_v59  ;;  %v2000_v62 = vpop.eup %1999 }
 0x151   :  { %v1827_v61 = vpop.f32.mrf.mxu1  ;;  %v2002_v1 = vpop.eup %2001 }
 0x152   :  { %v577_v63 = vpop.f32.mrf.mxu0 }
 0x153   :  { %v729_v0 = vpop.f32.mrf.mxu1  ;;  %2015 = vtanh.f32 %v577_v63 }
 0x154   :  { %v2004_v2 = vpop.eup %2003  ;;  %v1754_v3 = vpop.f32.mrf.mxu0  ;;  %2017 = vtanh.f32 %v729_v0 }
 0x155   :  { %v1830_v4 = vpop.f32.mrf.mxu1  ;;  %v2006_v5 = vpop.eup %2005  ;;  %v1491_v6 = vpack.c.bf16 %v2004_v2, %v2000_v62 }
 0x156   :  { %v1586_v7 = vpack.c.bf16 %v2006_v5, %v2002_v1  ;;  %v580_v8 = vpop.f32.mrf.mxu0 }
 0x157   :  { %v732_v9 = vpop.f32.mrf.mxu1  ;;  %1616 = vst [vmem:[%s2407_s2 + $0x70] sm:$0xff] %v1491_v6   ;;  %2019 = vtanh.f32 %v580_v8 }
 0x158   :  { %1635 = vst [vmem:[%s2407_s2 + $0x108] sm:$0xff] %v1586_v7   ;;  %v1755_v10 = vpop.f32.mrf.mxu0  ;;  %2021 = vtanh.f32 %v732_v9  ;;  %v2008_v12 = vpop.eup %2007 }
 0x159   :  { %v1831_v11 = vpop.f32.mrf.mxu1  ;;  %v2010_v15 = vpop.eup %2009 }
 0x15a   :  { %v585_v13 = vpop.f32.mrf.mxu0 }
 0x15b   :  { %v737_v14 = vpop.f32.mrf.mxu1  ;;  %2023 = vtanh.f32 %v585_v13 }
 0x15c   :  { %v2012_v16 = vpop.eup %2011  ;;  %v1758_v17 = vpop.f32.mrf.mxu0  ;;  %2025 = vtanh.f32 %v737_v14 }
 0x15d   :  { %v1834_v18 = vpop.f32.mrf.mxu1  ;;  %v2014_v19 = vpop.eup %2013  ;;  %v1496_v20 = vpack.c.bf16 %v2012_v16, %v2008_v12 }
 0x15e   :  { %v1591_v21 = vpack.c.bf16 %v2014_v19, %v2010_v15  ;;  %v588_v22 = vpop.f32.mrf.mxu0 }
 0x15f   :  { %v740_v23 = vpop.f32.mrf.mxu1  ;;  %1617 = vst [vmem:[%s2407_s2 + $0x78] sm:$0xff] %v1496_v20   ;;  %2027 = vtanh.f32 %v588_v22 }
 0x160   :  { %1636 = vst [vmem:[%s2407_s2 + $0x110] sm:$0xff] %v1591_v21   ;;  %v1759_v24 = vpop.f32.mrf.mxu0  ;;  %2029 = vtanh.f32 %v740_v23  ;;  %v2016_v26 = vpop.eup %2015 }
 0x161   :  { %v1835_v25 = vpop.f32.mrf.mxu1  ;;  %v2018_v28 = vpop.eup %2017 }
 0x162   :  { %v593_v27 = vpop.f32.mrf.mxu0 }
 0x163   :  { %2031 = vtanh.f32 %v593_v27 }
 0x164   :  { %v2020_v29 = vpop.eup %2019  ;;  %v1762_v30 = vpop.f32.mrf.mxu0 }
 0x165   :  { %v2022_v31 = vpop.eup %2021  ;;  %v1501_v32 = vpack.c.bf16 %v2020_v29, %v2016_v26 }
 0x166   :  { %v1596_v33 = vpack.c.bf16 %v2022_v31, %v2018_v28  ;;  %v596_v34 = vpop.f32.mrf.mxu0 }
 0x167   :  { %1618 = vst [vmem:[%s2407_s2 + $0x80] sm:$0xff] %v1501_v32   ;;  %2033 = vtanh.f32 %v596_v34 }
 0x168   :  { %1637 = vst [vmem:[%s2407_s2 + $0x118] sm:$0xff] %v1596_v33   ;;  %v1763_v35 = vpop.f32.mrf.mxu0  ;;  %v2024_v36 = vpop.eup %2023 }
 0x169   :  { %v2026_v37 = vpop.eup %2025 }
 0x16c   :  { %v2028_v38 = vpop.eup %2027 }
 0x16d   :  { %v2030_v39 = vpop.eup %2029  ;;  %v1506_v40 = vpack.c.bf16 %v2028_v38, %v2024_v36 }
 0x16e   :  { %v1601_v41 = vpack.c.bf16 %v2030_v39, %v2026_v37 }
 0x16f   :  { %1619 = vst [vmem:[%s2407_s2 + $0x88] sm:$0xff] %v1506_v40  }
 0x170   :  { %1638 = vst [vmem:[%s2407_s2 + $0x120] sm:$0xff] %v1601_v41   ;;  %v2032_v42 = vpop.eup %2031 }
 0x174   :  { %v2034_v43 = vpop.eup %2033 }
 0x175   :  { %v1511_v44 = vpack.c.bf16 %v2034_v43, %v2032_v42 }
 0x177   :  { %1620 = vst [vmem:[%s2407_s2 + $0x90] sm:$0xff] %v1511_v44  }

</bundles_post_ra>
